<compile_context>
chip_gen: v7x
topology: tpu7x:2x2x1
jax: 0.10.0
libtpu: 0.0.40
codegen_flags: <defaults>
</compile_context>

<pallas_src>
import functools

import jax
import jax.numpy as jnp
from jax.experimental import pallas as pl
from jax.experimental.pallas import tpu as pltpu


# ----------------------------- Pallas kernel --------------------------------
def _deconv3d_block_kernel(x_ref, w_ref, m_ref, *rest, H, W,
                           apply_norm, use_leaky_relu):
    # x_ref  : (Cin, S)        f32   one batch element, spatial flattened (S = D*H*W)
    # w_ref  : (Cout, 27*Cin)  f32   effective (flipped) ConvTranspose3d weights
    # m_ref  : (27, S)         f32   0/1 validity mask per tap (boundary handling)
    # b_ref  : (Cout, 1)       f32   conv bias, ONLY present when apply_norm=False
    # o_ref  : (Cout, S)
    # col_ref: (27*Cin, S)     f32   VMEM scratch holding the im2col matrix
    if apply_norm:
        o_ref, col_ref = rest
    else:
        b_ref, o_ref, col_ref = rest

    Cin, S = x_ref.shape
    HW = H * W

    x = x_ref[...]                                    # (Cin, S) f32

    # ---- build the im2col matrix -------------------------------------------
    # Row (k*Cin + ci) holds input channel ci shifted by tap k = (kd, kh, kw)
    # along the flattened spatial axis; out-of-volume positions are zeroed by
    # the precomputed mask.  Shifts are flat lane-axis rolls — no 3-D strided
    # slice+reshape relayouts and no padded input copy.
    k = 0
    for dd in (-1, 0, 1):
        for dh in (-1, 0, 1):
            for dw in (-1, 0, 1):
                offset = dd * HW + dh * W + dw        # static per tap
                if offset == 0:
                    piece = x                         # center tap: mask is all-ones
                else:
                    piece = jnp.roll(x, -offset, axis=1) * m_ref[k:k + 1, :]
                col_ref[k * Cin:(k + 1) * Cin, :] = piece
                k += 1

    # ---- one fused MXU matmul: (Cout, 27*Cin) @ (27*Cin, S) -> (Cout, S) ----
    acc = jnp.dot(w_ref[...], col_ref[...],
                  preferred_element_type=jnp.float32)

    if apply_norm:
        # InstanceNorm3d (no affine, eps=1e-5, biased variance).  The conv bias
        # is cancelled exactly by the mean subtraction, so it is skipped.
        mean = jnp.mean(acc, axis=1, keepdims=True)
        cen = acc - mean
        var = jnp.mean(cen * cen, axis=1, keepdims=True)
        y = cen * jax.lax.rsqrt(var + 1e-5)
    else:
        y = acc + b_ref[...]                          # (Cout, 1) broadcast

    if use_leaky_relu:
        y = jnp.where(y >= 0.0, y, 0.01 * y)          # F.leaky_relu default slope
    else:
        y = jnp.maximum(y, 0.0)

    o_ref[...] = y.astype(o_ref.dtype)


# ------------------------------- wrapper -------------------------------------
def deconv3d_block(x, weight_pt, bias, *, use_leaky_relu=False):
    """Forward of Deconv3dBlock (kernelSize=3, convStride=1, padding=1, bias=True).

    x         : (N, Cin, D, H, W)     NCDHW (PyTorch layout)
    weight_pt : (Cin, Cout, 3, 3, 3)  PyTorch ConvTranspose3d weight layout
    bias      : (Cout,)
    returns   : (N, Cout, D, H, W)
    """
    # TODO(synk): useSpectralNorm=True (nn.utils.spectral_norm reparam) is not
    #             implemented; only the default constructor path is covered.
    N, Cin, D, H, W = x.shape
    Cout = weight_pt.shape[1]
    S = D * H * W
    KKK = 27

    # ConvTranspose3d(s=1, p=1, k=3) == dense conv with spatially flipped weights:
    #   W2[co, k*Cin + ci] = w_pt[ci, co, 2-kd, 2-kh, 2-kw],  k = (kd*3 + kh)*3 + kw
    w_eff = jnp.flip(weight_pt, axis=(2, 3, 4))                    # (Cin,Cout,3,3,3)
    w2 = jnp.transpose(w_eff, (1, 2, 3, 4, 0)).reshape(Cout, KKK * Cin)
    w2 = w2.astype(jnp.float32)                                    # f32 MXU, f32 acc

    # Per-tap 0/1 validity masks over flattened spatial positions (tiny constant).
    sidx = jnp.arange(S)
    d_i = sidx // (H * W)
    h_i = (sidx // W) % H
    w_i = sidx % W
    masks = []
    for dd in (-1, 0, 1):
        for dh in (-1, 0, 1):
            for dw in (-1, 0, 1):
                m = ((d_i + dd >= 0) & (d_i + dd < D) &
                     (h_i + dh >= 0) & (h_i + dh < H) &
                     (w_i + dw >= 0) & (w_i + dw < W))
                masks.append(m)
    masks = jnp.stack(masks, axis=0).astype(jnp.float32)           # (27, S)

    x_flat = x.reshape(N, Cin, S).astype(jnp.float32)  # free reshape; no padded copy
    apply_norm = S > 8                     # featureMapSize test from the module

    kernel = functools.partial(_deconv3d_block_kernel, H=H, W=W,
                               apply_norm=apply_norm,
                               use_leaky_relu=use_leaky_relu)

    in_specs = [
        pl.BlockSpec((None, Cin, S), lambda n: (n, 0, 0)),         # x (per batch)
        pl.BlockSpec((Cout, KKK * Cin), lambda n: (0, 0)),         # fused weights
        pl.BlockSpec((KKK, S), lambda n: (0, 0)),                  # boundary masks
    ]
    args = [x_flat, w2, masks]
    if not apply_norm:                     # bias only needed when norm is skipped
        in_specs.append(pl.BlockSpec((Cout, 1), lambda n: (0, 0)))
        args.append(bias.reshape(Cout, 1).astype(jnp.float32))

    out = pl.pallas_call(
        kernel,
        out_shape=jax.ShapeDtypeStruct((N, Cout, S), jnp.float32),
        grid_spec=pltpu.PrefetchScalarGridSpec(
            num_scalar_prefetch=0,
            grid=(N,),
            in_specs=in_specs,
            out_specs=pl.BlockSpec((None, Cout, S), lambda n: (n, 0, 0)),
            scratch_shapes=[pltpu.VMEM((KKK * Cin, S), jnp.float32)],
        ),
        compiler_params=pltpu.CompilerParams(
            dimension_semantics=("parallel",)),
    )(*args)

    return out.reshape(N, Cout, D, H, W)


# --------------------------- pure-JAX reference ------------------------------
def deconv3d_block_ref(x, weight_pt, bias, *, use_leaky_relu=False):
    # x: (N, Cin, D, H, W); returns (N, Cout, D, H, W).  All math in f32 to mirror
    # the kernel's numerics (f32 operands, f32 accumulation).
    N, Cin, D, H, W = x.shape
    Cout = weight_pt.shape[1]
    w_eff = jnp.flip(weight_pt, axis=(2, 3, 4)).astype(jnp.float32)  # (Cin,Cout,3,3,3)
    xp = jnp.pad(x.astype(jnp.float32),
                 ((0, 0), (0, 0), (1, 1), (1, 1), (1, 1)))
    acc = jnp.zeros((N, Cout, D, H, W), jnp.float32)
    for kd in range(3):
        for kh in range(3):
            for kw in range(3):
                patch = xp[:, :, kd:kd + D, kh:kh + H, kw:kw + W]
                wk = w_eff[:, :, kd, kh, kw]                         # (Cin, Cout)
                acc = acc + jnp.einsum('nidhw,io->nodhw', patch, wk,
                                       preferred_element_type=jnp.float32)
    acc = acc + bias.reshape(1, Cout, 1, 1, 1).astype(jnp.float32)
    if D * H * W > 8:
        mean = jnp.mean(acc, axis=(2, 3, 4), keepdims=True)
        var = jnp.mean((acc - mean) ** 2, axis=(2, 3, 4), keepdims=True)
        acc = (acc - mean) * jax.lax.rsqrt(var + 1e-5)
    if use_leaky_relu:
        return jnp.where(acc >= 0, acc, 0.01 * acc)
    return jnp.maximum(acc, 0.0)


# ---------------------------------- main --------------------------------------
if __name__ == "__main__":
    N, Cin, Cout = 2, 4, 8
    D = H = W = 8          # featureMapSize = 512 > 8 -> InstanceNorm + ReLU path

    key = jax.random.PRNGKey(0)
    kx, kw, kb = jax.random.split(key, 3)

    x = jax.random.normal(kx, (N, Cin, D, H, W), dtype=jnp.float32)     # NCDHW
    # deterministic synthetic parameters (ConvTranspose3d layout: Cin, Cout, 3, 3, 3)
    weight = 0.1 * jax.random.normal(kw, (Cin, Cout, 3, 3, 3), dtype=jnp.float32)
    bias = 0.1 * jax.random.normal(kb, (Cout,), dtype=jnp.float32)

    y = deconv3d_block(x, weight, bias, use_leaky_relu=False)
    y = jax.block_until_ready(y)

    y_ref = deconv3d_block_ref(x, weight, bias, use_leaky_relu=False)
    assert y.shape == (N, Cout, D, H, W)
    assert jnp.allclose(y, y_ref, atol=2e-3, rtol=2e-3), "mismatch vs reference"

    print("KERNEL_OK")
</pallas_src>

<mosaic_0001>
module attributes {stable_mosaic.version = 11 : i64} {
  func.func @_deconv3d_block_kernel(%arg0: i32, %arg1: memref<1x4x512xf32, #tpu.memory_space<vmem>>, %arg2: memref<8x108xf32, #tpu.memory_space<vmem>>, %arg3: memref<27x512xf32, #tpu.memory_space<vmem>>, %arg4: memref<1x8x512xf32, #tpu.memory_space<vmem>>, %arg5: memref<108x512xf32, #tpu.memory_space<vmem>>) attributes {dimension_semantics = [#tpu.dimension_semantics<parallel>], iteration_bounds = array<i64: 2>, scalar_prefetch = 0 : i64, scratch_operands = 1 : i64, tpu.core_type = #tpu.core_type<tc>, window_params = [{transform_indices = @transform_0, window_bounds = array<i64: 1, 4, 512>}, {pipeline_mode = #tpu.pipeline_mode<synchronous>, transform_indices = @transform_1, window_bounds = array<i64: 8, 108>}, {pipeline_mode = #tpu.pipeline_mode<synchronous>, transform_indices = @transform_2, window_bounds = array<i64: 27, 512>}, {transform_indices = @transform_3, window_bounds = array<i64: 1, 8, 512>}]} {
    %c0 = arith.constant 0 : index
    %c0_0 = arith.constant 0 : index
    %c0_1 = arith.constant 0 : index
    %0 = vector.load %arg1[%c0, %c0_0, %c0_1] : memref<1x4x512xf32, #tpu.memory_space<vmem>>, vector<1x4x512xf32>
    %1 = vector.shape_cast %0 : vector<1x4x512xf32> to vector<4x512xf32>
    %2 = vector.extract_strided_slice %1 {offsets = [0, 439], sizes = [4, 73], strides = [1, 1]} : vector<4x512xf32> to vector<4x73xf32>
    %3 = vector.extract_strided_slice %1 {offsets = [0, 0], sizes = [4, 439], strides = [1, 1]} : vector<4x512xf32> to vector<4x439xf32>
    %4 = tpu.concatenate %2, %3 in 1 : vector<4x73xf32>, vector<4x439xf32> -> vector<4x512xf32>
    %c0_2 = arith.constant 0 : index
    %c0_3 = arith.constant 0 : index
    %5 = vector.load %arg3[%c0_2, %c0_3] : memref<27x512xf32, #tpu.memory_space<vmem>>, vector<1x512xf32>
    %6 = vector.broadcast %5 : vector<1x512xf32> to vector<4x512xf32>
    %7 = arith.mulf %4, %6 : vector<4x512xf32>
    %c0_4 = arith.constant 0 : index
    %c0_5 = arith.constant 0 : index
    %8 = vector.load %arg5[%c0_4, %c0_5] : memref<108x512xf32, #tpu.memory_space<vmem>>, vector<4x512xf32>
    tpu.vector_store %arg5[%c0_4, %c0_5], %7 {strides = array<i32>} : memref<108x512xf32, #tpu.memory_space<vmem>>, vector<4x512xf32>,
    %9 = vector.extract_strided_slice %1 {offsets = [0, 440], sizes = [4, 72], strides = [1, 1]} : vector<4x512xf32> to vector<4x72xf32>
    %10 = vector.extract_strided_slice %1 {offsets = [0, 0], sizes = [4, 440], strides = [1, 1]} : vector<4x512xf32> to vector<4x440xf32>
    %11 = tpu.concatenate %9, %10 in 1 : vector<4x72xf32>, vector<4x440xf32> -> vector<4x512xf32>
    %c1 = arith.constant 1 : index
    %c0_6 = arith.constant 0 : index
    %12 = vector.load %arg3[%c1, %c0_6] : memref<27x512xf32, #tpu.memory_space<vmem>>, vector<1x512xf32>
    %13 = vector.broadcast %12 : vector<1x512xf32> to vector<4x512xf32>
    %14 = arith.mulf %11, %13 : vector<4x512xf32>
    %c4 = arith.constant 4 : index
    %c0_7 = arith.constant 0 : index
    %15 = vector.load %arg5[%c4, %c0_7] : memref<108x512xf32, #tpu.memory_space<vmem>>, vector<4x512xf32>
    tpu.vector_store %arg5[%c4, %c0_7], %14 {strides = array<i32>} : memref<108x512xf32, #tpu.memory_space<vmem>>, vector<4x512xf32>,
    %16 = vector.extract_strided_slice %1 {offsets = [0, 441], sizes = [4, 71], strides = [1, 1]} : vector<4x512xf32> to vector<4x71xf32>
    %17 = vector.extract_strided_slice %1 {offsets = [0, 0], sizes = [4, 441], strides = [1, 1]} : vector<4x512xf32> to vector<4x441xf32>
    %18 = tpu.concatenate %16, %17 in 1 : vector<4x71xf32>, vector<4x441xf32> -> vector<4x512xf32>
    %c2 = arith.constant 2 : index
    %c0_8 = arith.constant 0 : index
    %19 = vector.load %arg3[%c2, %c0_8] : memref<27x512xf32, #tpu.memory_space<vmem>>, vector<1x512xf32>
    %20 = vector.broadcast %19 : vector<1x512xf32> to vector<4x512xf32>
    %21 = arith.mulf %18, %20 : vector<4x512xf32>
    %c8 = arith.constant 8 : index
    %c0_9 = arith.constant 0 : index
    %22 = vector.load %arg5[%c8, %c0_9] : memref<108x512xf32, #tpu.memory_space<vmem>>, vector<4x512xf32>
    tpu.vector_store %arg5[%c8, %c0_9], %21 {strides = array<i32>} : memref<108x512xf32, #tpu.memory_space<vmem>>, vector<4x512xf32>,
    %23 = vector.extract_strided_slice %1 {offsets = [0, 447], sizes = [4, 65], strides = [1, 1]} : vector<4x512xf32> to vector<4x65xf32>
    %24 = vector.extract_strided_slice %1 {offsets = [0, 0], sizes = [4, 447], strides = [1, 1]} : vector<4x512xf32> to vector<4x447xf32>
    %25 = tpu.concatenate %23, %24 in 1 : vector<4x65xf32>, vector<4x447xf32> -> vector<4x512xf32>
    %c3 = arith.constant 3 : index
    %c0_10 = arith.constant 0 : index
    %26 = vector.load %arg3[%c3, %c0_10] : memref<27x512xf32, #tpu.memory_space<vmem>>, vector<1x512xf32>
    %27 = vector.broadcast %26 : vector<1x512xf32> to vector<4x512xf32>
    %28 = arith.mulf %25, %27 : vector<4x512xf32>
    %c12 = arith.constant 12 : index
    %c0_11 = arith.constant 0 : index
    %29 = vector.load %arg5[%c12, %c0_11] : memref<108x512xf32, #tpu.memory_space<vmem>>, vector<4x512xf32>
    tpu.vector_store %arg5[%c12, %c0_11], %28 {strides = array<i32>} : memref<108x512xf32, #tpu.memory_space<vmem>>, vector<4x512xf32>,
    %30 = vector.extract_strided_slice %1 {offsets = [0, 448], sizes = [4, 64], strides = [1, 1]} : vector<4x512xf32> to vector<4x64xf32>
    %31 = vector.extract_strided_slice %1 {offsets = [0, 0], sizes = [4, 448], strides = [1, 1]} : vector<4x512xf32> to vector<4x448xf32>
    %32 = tpu.concatenate %30, %31 in 1 : vector<4x64xf32>, vector<4x448xf32> -> vector<4x512xf32>
    %c4_12 = arith.constant 4 : index
    %c0_13 = arith.constant 0 : index
    %33 = vector.load %arg3[%c4_12, %c0_13] : memref<27x512xf32, #tpu.memory_space<vmem>>, vector<1x512xf32>
    %34 = vector.broadcast %33 : vector<1x512xf32> to vector<4x512xf32>
    %35 = arith.mulf %32, %34 : vector<4x512xf32>
    %c16 = arith.constant 16 : index
    %c0_14 = arith.constant 0 : index
    %36 = vector.load %arg5[%c16, %c0_14] : memref<108x512xf32, #tpu.memory_space<vmem>>, vector<4x512xf32>
    tpu.vector_store %arg5[%c16, %c0_14], %35 {strides = array<i32>} : memref<108x512xf32, #tpu.memory_space<vmem>>, vector<4x512xf32>,
    %37 = vector.extract_strided_slice %1 {offsets = [0, 449], sizes = [4, 63], strides = [1, 1]} : vector<4x512xf32> to vector<4x63xf32>
    %38 = vector.extract_strided_slice %1 {offsets = [0, 0], sizes = [4, 449], strides = [1, 1]} : vector<4x512xf32> to vector<4x449xf32>
    %39 = tpu.concatenate %37, %38 in 1 : vector<4x63xf32>, vector<4x449xf32> -> vector<4x512xf32>
    %c5 = arith.constant 5 : index
    %c0_15 = arith.constant 0 : index
    %40 = vector.load %arg3[%c5, %c0_15] : memref<27x512xf32, #tpu.memory_space<vmem>>, vector<1x512xf32>
    %41 = vector.broadcast %40 : vector<1x512xf32> to vector<4x512xf32>
    %42 = arith.mulf %39, %41 : vector<4x512xf32>
    %c20 = arith.constant 20 : index
    %c0_16 = arith.constant 0 : index
    %43 = vector.load %arg5[%c20, %c0_16] : memref<108x512xf32, #tpu.memory_space<vmem>>, vector<4x512xf32>
    tpu.vector_store %arg5[%c20, %c0_16], %42 {strides = array<i32>} : memref<108x512xf32, #tpu.memory_space<vmem>>, vector<4x512xf32>,
    %44 = vector.extract_strided_slice %1 {offsets = [0, 455], sizes = [4, 57], strides = [1, 1]} : vector<4x512xf32> to vector<4x57xf32>
    %45 = vector.extract_strided_slice %1 {offsets = [0, 0], sizes = [4, 455], strides = [1, 1]} : vector<4x512xf32> to vector<4x455xf32>
    %46 = tpu.concatenate %44, %45 in 1 : vector<4x57xf32>, vector<4x455xf32> -> vector<4x512xf32>
    %c6 = arith.constant 6 : index
    %c0_17 = arith.constant 0 : index
    %47 = vector.load %arg3[%c6, %c0_17] : memref<27x512xf32, #tpu.memory_space<vmem>>, vector<1x512xf32>
    %48 = vector.broadcast %47 : vector<1x512xf32> to vector<4x512xf32>
    %49 = arith.mulf %46, %48 : vector<4x512xf32>
    %c24 = arith.constant 24 : index
    %c0_18 = arith.constant 0 : index
    %50 = vector.load %arg5[%c24, %c0_18] : memref<108x512xf32, #tpu.memory_space<vmem>>, vector<4x512xf32>
    tpu.vector_store %arg5[%c24, %c0_18], %49 {strides = array<i32>} : memref<108x512xf32, #tpu.memory_space<vmem>>, vector<4x512xf32>,
    %51 = vector.extract_strided_slice %1 {offsets = [0, 456], sizes = [4, 56], strides = [1, 1]} : vector<4x512xf32> to vector<4x56xf32>
    %52 = vector.extract_strided_slice %1 {offsets = [0, 0], sizes = [4, 456], strides = [1, 1]} : vector<4x512xf32> to vector<4x456xf32>
    %53 = tpu.concatenate %51, %52 in 1 : vector<4x56xf32>, vector<4x456xf32> -> vector<4x512xf32>
    %c7 = arith.constant 7 : index
    %c0_19 = arith.constant 0 : index
    %54 = vector.load %arg3[%c7, %c0_19] : memref<27x512xf32, #tpu.memory_space<vmem>>, vector<1x512xf32>
    %55 = vector.broadcast %54 : vector<1x512xf32> to vector<4x512xf32>
    %56 = arith.mulf %53, %55 : vector<4x512xf32>
    %c28 = arith.constant 28 : index
    %c0_20 = arith.constant 0 : index
    %57 = vector.load %arg5[%c28, %c0_20] : memref<108x512xf32, #tpu.memory_space<vmem>>, vector<4x512xf32>
    tpu.vector_store %arg5[%c28, %c0_20], %56 {strides = array<i32>} : memref<108x512xf32, #tpu.memory_space<vmem>>, vector<4x512xf32>,
    %58 = vector.extract_strided_slice %1 {offsets = [0, 457], sizes = [4, 55], strides = [1, 1]} : vector<4x512xf32> to vector<4x55xf32>
    %59 = vector.extract_strided_slice %1 {offsets = [0, 0], sizes = [4, 457], strides = [1, 1]} : vector<4x512xf32> to vector<4x457xf32>
    %60 = tpu.concatenate %58, %59 in 1 : vector<4x55xf32>, vector<4x457xf32> -> vector<4x512xf32>
    %c8_21 = arith.constant 8 : index
    %c0_22 = arith.constant 0 : index
    %61 = vector.load %arg3[%c8_21, %c0_22] : memref<27x512xf32, #tpu.memory_space<vmem>>, vector<1x512xf32>
    %62 = vector.broadcast %61 : vector<1x512xf32> to vector<4x512xf32>
    %63 = arith.mulf %60, %62 : vector<4x512xf32>
    %c32 = arith.constant 32 : index
    %c0_23 = arith.constant 0 : index
    %64 = vector.load %arg5[%c32, %c0_23] : memref<108x512xf32, #tpu.memory_space<vmem>>, vector<4x512xf32>
    tpu.vector_store %arg5[%c32, %c0_23], %63 {strides = array<i32>} : memref<108x512xf32, #tpu.memory_space<vmem>>, vector<4x512xf32>,
    %65 = vector.extract_strided_slice %1 {offsets = [0, 503], sizes = [4, 9], strides = [1, 1]} : vector<4x512xf32> to vector<4x9xf32>
    %66 = vector.extract_strided_slice %1 {offsets = [0, 0], sizes = [4, 503], strides = [1, 1]} : vector<4x512xf32> to vector<4x503xf32>
    %67 = tpu.concatenate %65, %66 in 1 : vector<4x9xf32>, vector<4x503xf32> -> vector<4x512xf32>
    %c9 = arith.constant 9 : index
    %c0_24 = arith.constant 0 : index
    %68 = vector.load %arg3[%c9, %c0_24] : memref<27x512xf32, #tpu.memory_space<vmem>>, vector<1x512xf32>
    %69 = vector.broadcast %68 : vector<1x512xf32> to vector<4x512xf32>
    %70 = arith.mulf %67, %69 : vector<4x512xf32>
    %c36 = arith.constant 36 : index
    %c0_25 = arith.constant 0 : index
    %71 = vector.load %arg5[%c36, %c0_25] : memref<108x512xf32, #tpu.memory_space<vmem>>, vector<4x512xf32>
    tpu.vector_store %arg5[%c36, %c0_25], %70 {strides = array<i32>} : memref<108x512xf32, #tpu.memory_space<vmem>>, vector<4x512xf32>,
    %72 = vector.extract_strided_slice %1 {offsets = [0, 504], sizes = [4, 8], strides = [1, 1]} : vector<4x512xf32> to vector<4x8xf32>
    %73 = vector.extract_strided_slice %1 {offsets = [0, 0], sizes = [4, 504], strides = [1, 1]} : vector<4x512xf32> to vector<4x504xf32>
    %74 = tpu.concatenate %72, %73 in 1 : vector<4x8xf32>, vector<4x504xf32> -> vector<4x512xf32>
    %c10 = arith.constant 10 : index
    %c0_26 = arith.constant 0 : index
    %75 = vector.load %arg3[%c10, %c0_26] : memref<27x512xf32, #tpu.memory_space<vmem>>, vector<1x512xf32>
    %76 = vector.broadcast %75 : vector<1x512xf32> to vector<4x512xf32>
    %77 = arith.mulf %74, %76 : vector<4x512xf32>
    %c40 = arith.constant 40 : index
    %c0_27 = arith.constant 0 : index
    %78 = vector.load %arg5[%c40, %c0_27] : memref<108x512xf32, #tpu.memory_space<vmem>>, vector<4x512xf32>
    tpu.vector_store %arg5[%c40, %c0_27], %77 {strides = array<i32>} : memref<108x512xf32, #tpu.memory_space<vmem>>, vector<4x512xf32>,
    %79 = vector.extract_strided_slice %1 {offsets = [0, 505], sizes = [4, 7], strides = [1, 1]} : vector<4x512xf32> to vector<4x7xf32>
    %80 = vector.extract_strided_slice %1 {offsets = [0, 0], sizes = [4, 505], strides = [1, 1]} : vector<4x512xf32> to vector<4x505xf32>
    %81 = tpu.concatenate %79, %80 in 1 : vector<4x7xf32>, vector<4x505xf32> -> vector<4x512xf32>
    %c11 = arith.constant 11 : index
    %c0_28 = arith.constant 0 : index
    %82 = vector.load %arg3[%c11, %c0_28] : memref<27x512xf32, #tpu.memory_space<vmem>>, vector<1x512xf32>
    %83 = vector.broadcast %82 : vector<1x512xf32> to vector<4x512xf32>
    %84 = arith.mulf %81, %83 : vector<4x512xf32>
    %c44 = arith.constant 44 : index
    %c0_29 = arith.constant 0 : index
    %85 = vector.load %arg5[%c44, %c0_29] : memref<108x512xf32, #tpu.memory_space<vmem>>, vector<4x512xf32>
    tpu.vector_store %arg5[%c44, %c0_29], %84 {strides = array<i32>} : memref<108x512xf32, #tpu.memory_space<vmem>>, vector<4x512xf32>,
    %86 = vector.extract_strided_slice %1 {offsets = [0, 511], sizes = [4, 1], strides = [1, 1]} : vector<4x512xf32> to vector<4x1xf32>
    %87 = vector.extract_strided_slice %1 {offsets = [0, 0], sizes = [4, 511], strides = [1, 1]} : vector<4x512xf32> to vector<4x511xf32>
    %88 = tpu.concatenate %86, %87 in 1 : vector<4x1xf32>, vector<4x511xf32> -> vector<4x512xf32>
    %c12_30 = arith.constant 12 : index
    %c0_31 = arith.constant 0 : index
    %89 = vector.load %arg3[%c12_30, %c0_31] : memref<27x512xf32, #tpu.memory_space<vmem>>, vector<1x512xf32>
    %90 = vector.broadcast %89 : vector<1x512xf32> to vector<4x512xf32>
    %91 = arith.mulf %88, %90 : vector<4x512xf32>
    %c48 = arith.constant 48 : index
    %c0_32 = arith.constant 0 : index
    %92 = vector.load %arg5[%c48, %c0_32] : memref<108x512xf32, #tpu.memory_space<vmem>>, vector<4x512xf32>
    tpu.vector_store %arg5[%c48, %c0_32], %91 {strides = array<i32>} : memref<108x512xf32, #tpu.memory_space<vmem>>, vector<4x512xf32>,
    %c52 = arith.constant 52 : index
    %c0_33 = arith.constant 0 : index
    %93 = vector.load %arg5[%c52, %c0_33] : memref<108x512xf32, #tpu.memory_space<vmem>>, vector<4x512xf32>
    tpu.vector_store %arg5[%c52, %c0_33], %1 {strides = array<i32>} : memref<108x512xf32, #tpu.memory_space<vmem>>, vector<4x512xf32>,
    %94 = vector.extract_strided_slice %1 {offsets = [0, 1], sizes = [4, 511], strides = [1, 1]} : vector<4x512xf32> to vector<4x511xf32>
    %95 = vector.extract_strided_slice %1 {offsets = [0, 0], sizes = [4, 1], strides = [1, 1]} : vector<4x512xf32> to vector<4x1xf32>
    %96 = tpu.concatenate %94, %95 in 1 : vector<4x511xf32>, vector<4x1xf32> -> vector<4x512xf32>
    %c14 = arith.constant 14 : index
    %c0_34 = arith.constant 0 : index
    %97 = vector.load %arg3[%c14, %c0_34] : memref<27x512xf32, #tpu.memory_space<vmem>>, vector<1x512xf32>
    %98 = vector.broadcast %97 : vector<1x512xf32> to vector<4x512xf32>
    %99 = arith.mulf %96, %98 : vector<4x512xf32>
    %c56 = arith.constant 56 : index
    %c0_35 = arith.constant 0 : index
    %100 = vector.load %arg5[%c56, %c0_35] : memref<108x512xf32, #tpu.memory_space<vmem>>, vector<4x512xf32>
    tpu.vector_store %arg5[%c56, %c0_35], %99 {strides = array<i32>} : memref<108x512xf32, #tpu.memory_space<vmem>>, vector<4x512xf32>,
    %101 = vector.extract_strided_slice %1 {offsets = [0, 7], sizes = [4, 505], strides = [1, 1]} : vector<4x512xf32> to vector<4x505xf32>
    %102 = vector.extract_strided_slice %1 {offsets = [0, 0], sizes = [4, 7], strides = [1, 1]} : vector<4x512xf32> to vector<4x7xf32>
    %103 = tpu.concatenate %101, %102 in 1 : vector<4x505xf32>, vector<4x7xf32> -> vector<4x512xf32>
    %c15 = arith.constant 15 : index
    %c0_36 = arith.constant 0 : index
    %104 = vector.load %arg3[%c15, %c0_36] : memref<27x512xf32, #tpu.memory_space<vmem>>, vector<1x512xf32>
    %105 = vector.broadcast %104 : vector<1x512xf32> to vector<4x512xf32>
    %106 = arith.mulf %103, %105 : vector<4x512xf32>
    %c60 = arith.constant 60 : index
    %c0_37 = arith.constant 0 : index
    %107 = vector.load %arg5[%c60, %c0_37] : memref<108x512xf32, #tpu.memory_space<vmem>>, vector<4x512xf32>
    tpu.vector_store %arg5[%c60, %c0_37], %106 {strides = array<i32>} : memref<108x512xf32, #tpu.memory_space<vmem>>, vector<4x512xf32>,
    %108 = vector.extract_strided_slice %1 {offsets = [0, 8], sizes = [4, 504], strides = [1, 1]} : vector<4x512xf32> to vector<4x504xf32>
    %109 = vector.extract_strided_slice %1 {offsets = [0, 0], sizes = [4, 8], strides = [1, 1]} : vector<4x512xf32> to vector<4x8xf32>
    %110 = tpu.concatenate %108, %109 in 1 : vector<4x504xf32>, vector<4x8xf32> -> vector<4x512xf32>
    %c16_38 = arith.constant 16 : index
    %c0_39 = arith.constant 0 : index
    %111 = vector.load %arg3[%c16_38, %c0_39] : memref<27x512xf32, #tpu.memory_space<vmem>>, vector<1x512xf32>
    %112 = vector.broadcast %111 : vector<1x512xf32> to vector<4x512xf32>
    %113 = arith.mulf %110, %112 : vector<4x512xf32>
    %c64 = arith.constant 64 : index
    %c0_40 = arith.constant 0 : index
    %114 = vector.load %arg5[%c64, %c0_40] : memref<108x512xf32, #tpu.memory_space<vmem>>, vector<4x512xf32>
    tpu.vector_store %arg5[%c64, %c0_40], %113 {strides = array<i32>} : memref<108x512xf32, #tpu.memory_space<vmem>>, vector<4x512xf32>,
    %115 = vector.extract_strided_slice %1 {offsets = [0, 9], sizes = [4, 503], strides = [1, 1]} : vector<4x512xf32> to vector<4x503xf32>
    %116 = vector.extract_strided_slice %1 {offsets = [0, 0], sizes = [4, 9], strides = [1, 1]} : vector<4x512xf32> to vector<4x9xf32>
    %117 = tpu.concatenate %115, %116 in 1 : vector<4x503xf32>, vector<4x9xf32> -> vector<4x512xf32>
    %c17 = arith.constant 17 : index
    %c0_41 = arith.constant 0 : index
    %118 = vector.load %arg3[%c17, %c0_41] : memref<27x512xf32, #tpu.memory_space<vmem>>, vector<1x512xf32>
    %119 = vector.broadcast %118 : vector<1x512xf32> to vector<4x512xf32>
    %120 = arith.mulf %117, %119 : vector<4x512xf32>
    %c68 = arith.constant 68 : index
    %c0_42 = arith.constant 0 : index
    %121 = vector.load %arg5[%c68, %c0_42] : memref<108x512xf32, #tpu.memory_space<vmem>>, vector<4x512xf32>
    tpu.vector_store %arg5[%c68, %c0_42], %120 {strides = array<i32>} : memref<108x512xf32, #tpu.memory_space<vmem>>, vector<4x512xf32>,
    %122 = vector.extract_strided_slice %1 {offsets = [0, 55], sizes = [4, 457], strides = [1, 1]} : vector<4x512xf32> to vector<4x457xf32>
    %123 = vector.extract_strided_slice %1 {offsets = [0, 0], sizes = [4, 55], strides = [1, 1]} : vector<4x512xf32> to vector<4x55xf32>
    %124 = tpu.concatenate %122, %123 in 1 : vector<4x457xf32>, vector<4x55xf32> -> vector<4x512xf32>
    %c18 = arith.constant 18 : index
    %c0_43 = arith.constant 0 : index
    %125 = vector.load %arg3[%c18, %c0_43] : memref<27x512xf32, #tpu.memory_space<vmem>>, vector<1x512xf32>
    %126 = vector.broadcast %125 : vector<1x512xf32> to vector<4x512xf32>
    %127 = arith.mulf %124, %126 : vector<4x512xf32>
    %c72 = arith.constant 72 : index
    %c0_44 = arith.constant 0 : index
    %128 = vector.load %arg5[%c72, %c0_44] : memref<108x512xf32, #tpu.memory_space<vmem>>, vector<4x512xf32>
    tpu.vector_store %arg5[%c72, %c0_44], %127 {strides = array<i32>} : memref<108x512xf32, #tpu.memory_space<vmem>>, vector<4x512xf32>,
    %129 = vector.extract_strided_slice %1 {offsets = [0, 56], sizes = [4, 456], strides = [1, 1]} : vector<4x512xf32> to vector<4x456xf32>
    %130 = vector.extract_strided_slice %1 {offsets = [0, 0], sizes = [4, 56], strides = [1, 1]} : vector<4x512xf32> to vector<4x56xf32>
    %131 = tpu.concatenate %129, %130 in 1 : vector<4x456xf32>, vector<4x56xf32> -> vector<4x512xf32>
    %c19 = arith.constant 19 : index
    %c0_45 = arith.constant 0 : index
    %132 = vector.load %arg3[%c19, %c0_45] : memref<27x512xf32, #tpu.memory_space<vmem>>, vector<1x512xf32>
    %133 = vector.broadcast %132 : vector<1x512xf32> to vector<4x512xf32>
    %134 = arith.mulf %131, %133 : vector<4x512xf32>
    %c76 = arith.constant 76 : index
    %c0_46 = arith.constant 0 : index
    %135 = vector.load %arg5[%c76, %c0_46] : memref<108x512xf32, #tpu.memory_space<vmem>>, vector<4x512xf32>
    tpu.vector_store %arg5[%c76, %c0_46], %134 {strides = array<i32>} : memref<108x512xf32, #tpu.memory_space<vmem>>, vector<4x512xf32>,
    %136 = vector.extract_strided_slice %1 {offsets = [0, 57], sizes = [4, 455], strides = [1, 1]} : vector<4x512xf32> to vector<4x455xf32>
    %137 = vector.extract_strided_slice %1 {offsets = [0, 0], sizes = [4, 57], strides = [1, 1]} : vector<4x512xf32> to vector<4x57xf32>
    %138 = tpu.concatenate %136, %137 in 1 : vector<4x455xf32>, vector<4x57xf32> -> vector<4x512xf32>
    %c20_47 = arith.constant 20 : index
    %c0_48 = arith.constant 0 : index
    %139 = vector.load %arg3[%c20_47, %c0_48] : memref<27x512xf32, #tpu.memory_space<vmem>>, vector<1x512xf32>
    %140 = vector.broadcast %139 : vector<1x512xf32> to vector<4x512xf32>
    %141 = arith.mulf %138, %140 : vector<4x512xf32>
    %c80 = arith.constant 80 : index
    %c0_49 = arith.constant 0 : index
    %142 = vector.load %arg5[%c80, %c0_49] : memref<108x512xf32, #tpu.memory_space<vmem>>, vector<4x512xf32>
    tpu.vector_store %arg5[%c80, %c0_49], %141 {strides = array<i32>} : memref<108x512xf32, #tpu.memory_space<vmem>>, vector<4x512xf32>,
    %143 = vector.extract_strided_slice %1 {offsets = [0, 63], sizes = [4, 449], strides = [1, 1]} : vector<4x512xf32> to vector<4x449xf32>
    %144 = vector.extract_strided_slice %1 {offsets = [0, 0], sizes = [4, 63], strides = [1, 1]} : vector<4x512xf32> to vector<4x63xf32>
    %145 = tpu.concatenate %143, %144 in 1 : vector<4x449xf32>, vector<4x63xf32> -> vector<4x512xf32>
    %c21 = arith.constant 21 : index
    %c0_50 = arith.constant 0 : index
    %146 = vector.load %arg3[%c21, %c0_50] : memref<27x512xf32, #tpu.memory_space<vmem>>, vector<1x512xf32>
    %147 = vector.broadcast %146 : vector<1x512xf32> to vector<4x512xf32>
    %148 = arith.mulf %145, %147 : vector<4x512xf32>
    %c84 = arith.constant 84 : index
    %c0_51 = arith.constant 0 : index
    %149 = vector.load %arg5[%c84, %c0_51] : memref<108x512xf32, #tpu.memory_space<vmem>>, vector<4x512xf32>
    tpu.vector_store %arg5[%c84, %c0_51], %148 {strides = array<i32>} : memref<108x512xf32, #tpu.memory_space<vmem>>, vector<4x512xf32>,
    %150 = vector.extract_strided_slice %1 {offsets = [0, 64], sizes = [4, 448], strides = [1, 1]} : vector<4x512xf32> to vector<4x448xf32>
    %151 = vector.extract_strided_slice %1 {offsets = [0, 0], sizes = [4, 64], strides = [1, 1]} : vector<4x512xf32> to vector<4x64xf32>
    %152 = tpu.concatenate %150, %151 in 1 : vector<4x448xf32>, vector<4x64xf32> -> vector<4x512xf32>
    %c22 = arith.constant 22 : index
    %c0_52 = arith.constant 0 : index
    %153 = vector.load %arg3[%c22, %c0_52] : memref<27x512xf32, #tpu.memory_space<vmem>>, vector<1x512xf32>
    %154 = vector.broadcast %153 : vector<1x512xf32> to vector<4x512xf32>
    %155 = arith.mulf %152, %154 : vector<4x512xf32>
    %c88 = arith.constant 88 : index
    %c0_53 = arith.constant 0 : index
    %156 = vector.load %arg5[%c88, %c0_53] : memref<108x512xf32, #tpu.memory_space<vmem>>, vector<4x512xf32>
    tpu.vector_store %arg5[%c88, %c0_53], %155 {strides = array<i32>} : memref<108x512xf32, #tpu.memory_space<vmem>>, vector<4x512xf32>,
    %157 = vector.extract_strided_slice %1 {offsets = [0, 65], sizes = [4, 447], strides = [1, 1]} : vector<4x512xf32> to vector<4x447xf32>
    %158 = vector.extract_strided_slice %1 {offsets = [0, 0], sizes = [4, 65], strides = [1, 1]} : vector<4x512xf32> to vector<4x65xf32>
    %159 = tpu.concatenate %157, %158 in 1 : vector<4x447xf32>, vector<4x65xf32> -> vector<4x512xf32>
    %c23 = arith.constant 23 : index
    %c0_54 = arith.constant 0 : index
    %160 = vector.load %arg3[%c23, %c0_54] : memref<27x512xf32, #tpu.memory_space<vmem>>, vector<1x512xf32>
    %161 = vector.broadcast %160 : vector<1x512xf32> to vector<4x512xf32>
    %162 = arith.mulf %159, %161 : vector<4x512xf32>
    %c92 = arith.constant 92 : index
    %c0_55 = arith.constant 0 : index
    %163 = vector.load %arg5[%c92, %c0_55] : memref<108x512xf32, #tpu.memory_space<vmem>>, vector<4x512xf32>
    tpu.vector_store %arg5[%c92, %c0_55], %162 {strides = array<i32>} : memref<108x512xf32, #tpu.memory_space<vmem>>, vector<4x512xf32>,
    %164 = vector.extract_strided_slice %1 {offsets = [0, 71], sizes = [4, 441], strides = [1, 1]} : vector<4x512xf32> to vector<4x441xf32>
    %165 = vector.extract_strided_slice %1 {offsets = [0, 0], sizes = [4, 71], strides = [1, 1]} : vector<4x512xf32> to vector<4x71xf32>
    %166 = tpu.concatenate %164, %165 in 1 : vector<4x441xf32>, vector<4x71xf32> -> vector<4x512xf32>
    %c24_56 = arith.constant 24 : index
    %c0_57 = arith.constant 0 : index
    %167 = vector.load %arg3[%c24_56, %c0_57] : memref<27x512xf32, #tpu.memory_space<vmem>>, vector<1x512xf32>
    %168 = vector.broadcast %167 : vector<1x512xf32> to vector<4x512xf32>
    %169 = arith.mulf %166, %168 : vector<4x512xf32>
    %c96 = arith.constant 96 : index
    %c0_58 = arith.constant 0 : index
    %170 = vector.load %arg5[%c96, %c0_58] : memref<108x512xf32, #tpu.memory_space<vmem>>, vector<4x512xf32>
    tpu.vector_store %arg5[%c96, %c0_58], %169 {strides = array<i32>} : memref<108x512xf32, #tpu.memory_space<vmem>>, vector<4x512xf32>,
    %171 = vector.extract_strided_slice %1 {offsets = [0, 72], sizes = [4, 440], strides = [1, 1]} : vector<4x512xf32> to vector<4x440xf32>
    %172 = vector.extract_strided_slice %1 {offsets = [0, 0], sizes = [4, 72], strides = [1, 1]} : vector<4x512xf32> to vector<4x72xf32>
    %173 = tpu.concatenate %171, %172 in 1 : vector<4x440xf32>, vector<4x72xf32> -> vector<4x512xf32>
    %c25 = arith.constant 25 : index
    %c0_59 = arith.constant 0 : index
    %174 = vector.load %arg3[%c25, %c0_59] : memref<27x512xf32, #tpu.memory_space<vmem>>, vector<1x512xf32>
    %175 = vector.broadcast %174 : vector<1x512xf32> to vector<4x512xf32>
    %176 = arith.mulf %173, %175 : vector<4x512xf32>
    %c100 = arith.constant 100 : index
    %c0_60 = arith.constant 0 : index
    %177 = vector.load %arg5[%c100, %c0_60] : memref<108x512xf32, #tpu.memory_space<vmem>>, vector<4x512xf32>
    tpu.vector_store %arg5[%c100, %c0_60], %176 {strides = array<i32>} : memref<108x512xf32, #tpu.memory_space<vmem>>, vector<4x512xf32>,
    %178 = vector.extract_strided_slice %1 {offsets = [0, 73], sizes = [4, 439], strides = [1, 1]} : vector<4x512xf32> to vector<4x439xf32>
    %179 = vector.extract_strided_slice %1 {offsets = [0, 0], sizes = [4, 73], strides = [1, 1]} : vector<4x512xf32> to vector<4x73xf32>
    %180 = tpu.concatenate %178, %179 in 1 : vector<4x439xf32>, vector<4x73xf32> -> vector<4x512xf32>
    %c26 = arith.constant 26 : index
    %c0_61 = arith.constant 0 : index
    %181 = vector.load %arg3[%c26, %c0_61] : memref<27x512xf32, #tpu.memory_space<vmem>>, vector<1x512xf32>
    %182 = vector.broadcast %181 : vector<1x512xf32> to vector<4x512xf32>
    %183 = arith.mulf %180, %182 : vector<4x512xf32>
    %c104 = arith.constant 104 : index
    %c0_62 = arith.constant 0 : index
    %184 = vector.load %arg5[%c104, %c0_62] : memref<108x512xf32, #tpu.memory_space<vmem>>, vector<4x512xf32>
    tpu.vector_store %arg5[%c104, %c0_62], %183 {strides = array<i32>} : memref<108x512xf32, #tpu.memory_space<vmem>>, vector<4x512xf32>,
    %c0_63 = arith.constant 0 : index
    %c0_64 = arith.constant 0 : index
    %185 = vector.load %arg2[%c0_63, %c0_64] : memref<8x108xf32, #tpu.memory_space<vmem>>, vector<8x108xf32>
    %c0_65 = arith.constant 0 : index
    %c0_66 = arith.constant 0 : index
    %186 = vector.load %arg5[%c0_65, %c0_66] : memref<108x512xf32, #tpu.memory_space<vmem>>, vector<108x512xf32>
    %cst = arith.constant dense<0.000000e+00> : vector<8x512xf32>
    %187 = tpu.matmul %185, %186, %cst {dimension_numbers = #tpu.dot_dimension_numbers<[1], [0], [0], [1], [0, 0, 1, 1], [], []>} : vector<8x108xf32>, vector<108x512xf32>, vector<8x512xf32> -> vector<8x512xf32>
    %cst_67 = arith.constant dense<0.000000e+00> : vector<8xf32>
    %188 = vector.multi_reduction <add>, %187, %cst_67 [1] : vector<8x512xf32> to vector<8xf32>
    %189 = vector.shape_cast %188 : vector<8xf32> to vector<8x1xf32>
    %cst_68 = arith.constant 5.120000e+02 : f32
    %190 = vector.broadcast %cst_68 : f32 to vector<8x1xf32>
    %191 = arith.divf %189, %190 : vector<8x1xf32>
    %192 = vector.broadcast %191 : vector<8x1xf32> to vector<8x512xf32>
    %193 = arith.subf %187, %192 : vector<8x512xf32>
    %194 = arith.mulf %193, %193 : vector<8x512xf32>
    %cst_69 = arith.constant dense<0.000000e+00> : vector<8xf32>
    %195 = vector.multi_reduction <add>, %194, %cst_69 [1] : vector<8x512xf32> to vector<8xf32>
    %196 = vector.shape_cast %195 : vector<8xf32> to vector<8x1xf32>
    %cst_70 = arith.constant 5.120000e+02 : f32
    %197 = vector.broadcast %cst_70 : f32 to vector<8x1xf32>
    %198 = arith.divf %196, %197 : vector<8x1xf32>
    %cst_71 = arith.constant 9.99999974E-6 : f32
    %199 = vector.broadcast %cst_71 : f32 to vector<8x1xf32>
    %200 = arith.addf %198, %199 : vector<8x1xf32>
    %201 = math.rsqrt %200 : vector<8x1xf32>
    %202 = vector.broadcast %201 : vector<8x1xf32> to vector<8x512xf32>
    %203 = arith.mulf %193, %202 : vector<8x512xf32>
    %cst_72 = arith.constant 0.000000e+00 : f32
    %204 = vector.broadcast %cst_72 : f32 to vector<8x512xf32>
    %205 = arith.maximumf %203, %204 : vector<8x512xf32>
    %c0_73 = arith.constant 0 : index
    %c0_74 = arith.constant 0 : index
    %c0_75 = arith.constant 0 : index
    %206 = vector.load %arg4[%c0_73, %c0_74, %c0_75] : memref<1x8x512xf32, #tpu.memory_space<vmem>>, vector<1x8x512xf32>
    %207 = vector.shape_cast %206 : vector<1x8x512xf32> to vector<8x512xf32>
    %208 = vector.shape_cast %205 : vector<8x512xf32> to vector<1x8x512xf32>
    tpu.vector_store %arg4[%c0_73, %c0_74, %c0_75], %208 {strides = array<i32>} : memref<1x8x512xf32, #tpu.memory_space<vmem>>, vector<1x8x512xf32>,
    return
  }
  func.func @transform_0(%arg0: i32) -> (i32, i32, i32) {
    %c0_i32 = arith.constant 0 : i32
    %c0_i32_0 = arith.constant 0 : i32
    %c0_i32_1 = arith.constant 0 : i32
    return %arg0, %c0_i32, %c0_i32_0 : i32, i32, i32
  }
  func.func @transform_1(%arg0: i32) -> (i32, i32) {
    %c0_i32 = arith.constant 0 : i32
    %c0_i32_0 = arith.constant 0 : i32
    %c0_i32_1 = arith.constant 0 : i32
    return %c0_i32, %c0_i32_0 : i32, i32
  }
  func.func @transform_2(%arg0: i32) -> (i32, i32) {
    %c0_i32 = arith.constant 0 : i32
    %c0_i32_0 = arith.constant 0 : i32
    %c0_i32_1 = arith.constant 0 : i32
    return %c0_i32, %c0_i32_0 : i32, i32
  }
  func.func @transform_3(%arg0: i32) -> (i32, i32, i32) {
    %c0_i32 = arith.constant 0 : i32
    %c0_i32_0 = arith.constant 0 : i32
    %c0_i32_1 = arith.constant 0 : i32
    return %arg0, %c0_i32, %c0_i32_0 : i32, i32, i32
  }
}

</mosaic_0001>

<bundles_post_ra>
// kernel: tpu_custom_call.1
= control target key start
LH: loop header
LB: loop body
LE: loop exit
PB: predicated region body
PF: predicated region fallthrough
CT: control target
= control target key end

     0   :  { %8 = vsyncpa [#allocation4], 0  ;;  %s2994_s0 = inlined_call_operand.hbm [shape: f32[2,4,512], index: 0, kind: input, shape index: {}]   ;;  %s2995_s1 = inlined_call_operand.hbm [shape: f32[8,108], index: 1, kind: input, shape index: {}]   ;;  %s2996_s2 = inlined_call_operand.hbm [shape: f32[27,512], index: 2, kind: input, shape index: {}]   ;;  %s2997_s3 = inlined_call_operand.hbm [shape: f32[2,8,512], index: 3, kind: output, shape index: {}]  }
   0x1   :  { %10 = vsyncpa [#allocation4 + $0x1], 0 }
   0x2   :  { %11 = vsyncpa [#allocation7], 0 }
   0x3   :  { %12 = vsyncpa [#allocation5], 0 }
   0x4   :  { %14 = vsyncpa [#allocation5 + $0x1], 0  ;;  %s2221_s12 = smov 0   ;;  %s2223_s13 = smov 0  }
   0x5   :  { %s2225_s14 = smov 0   ;;  %s2227_s15 = smov 0  }
   0x6 LB: > { %s2242_s16 = sadd.s32 4294967295, %s2174_s15   ;;  %s1838_s17 = sadd.s32 4294967294, %s2174_s15   ;;  %s2174_s15 = sphi %s2227_s15, %s3019_s15   ;;  %s2170_s14 = sphi %s2225_s14, %s3018_s14   ;;  %s2166_s13 = sphi %s2223_s13, %s3017_s13   ;;  %s2162_s12 = sphi %s2221_s12, %s3016_s12  }
   0x7   : > { %p40_p0 = scmp.ne.s32.totalorder %s2166_s13, %s2162_s12  ;;  %p2998_p1 = scmp.eq.s32.totalorder %s2242_s16, 0 }
   0x8   : > { %p112_p3 = scmp.eq.s32.totalorder %s1838_s17, 1  ;;  %p1839_p5 = scmp.ge.s32.totalorder %s2174_s15, 1 }
   0x9   : > { %p2251_p4 = por %p2998_p1, %p40_p0  ;;  %p119_p7 = scmp.lt.s32.totalorder %s2174_s15, 3 }
   0xa   : > { %p2256_p6 = por %p112_p3, %p40_p0  ;;  %s2176_s21 = smov [#allocation6]  }
   0xb   : > { %s3001_s18 = scalar_select %p2251_p4, 1, 0 }
   0xc   : > { %s3002_s19 = scalar_select %p2256_p6, 1, 0 }
   0xd   : > { %p2261_p8 = pnand %p1839_p5, %p119_p7  ;;  %s132_s22 = sshll.u32 %s2176_s21, 4  ;;  %s133_s22 = int_to_ptr.vmem [resolvable:$true] %s132_s22 }
   0xe   : > { %s2177_s23 = smov [#allocation8]   ;;  %s2018_s28 = scalar_lea.hbm %s2995_s1, 128 }
   0xf   : > { %s3003_s20 = scalar_select %p2261_p8, 1, 0 }
  0x10   : > { %p1936_p10 = pneg %p2261_p8  ;;  %s142_s24 = sshll.u32 %s2177_s23, 4  ;;  %s2274_s24 = int_to_ptr.vmem [resolvable:$true] %s142_s24 }
  0x11   : > { %p2019_p12 = scmp.ne.s32.totalorder %s2995_s1, %s2018_s28  ;;  %p2025_p5 = scmp.lt.u32.totalorder %s2018_s28, %s2995_s1 }
  0x12   : > { %p2270_p11 = pnand %p1936_p10, %p2998_p1 }
  0x14   : > { %p2020_p13 = pneg %p2270_p11 }
  0x16   : > { %p2021_p0 = pnand %p2020_p13, %p2019_p12 }
  0x18   : > { %p2022_p3 = pneg %p2021_p0 }
  0x1a   : > { %p2027_p7 = pnand %p2025_p5, %p2022_p3 }
  0x1c   : > { %2030 = shalt.err (!%p2027_p7)
}
  0x1d   : > { %s2031_s6 = scalar_lea.vmem %s133_s22, 128  ;;  %p2039_p2 = scmp.lt.s32.totalorder %s133_s22, %s133_s22 }
  0x1e   : > { %p2032_p10 = scmp.ne.s32.totalorder %s133_s22, %s2031_s6  ;;  %p2040_p6 = scmp.lt.s32.totalorder %s2031_s6, %s2031_s6 }
  0x20   : > { %p2034_p9 = pnand %p2032_p10, %p2020_p13  ;;  %p2041_p4 = por %p2040_p6, %p2039_p2 }
  0x22   : > { %p2035_p1 = pneg %p2034_p9 }
  0x24   : > { %p2042_p8 = pnand %p2041_p4, %p2035_p1 }
  0x26   : > { %2045 = shalt.err (!%p2042_p8)
}
  0x27   : > { %1939 = dma.hbm_to_vmem [thread:$0]  (!%p2270_p11), %s2995_s1, 128, %s133_s22, [#allocation7]  }
  0x28   : > { %s2046_s11 = scalar_lea.hbm %s2996_s2, 2048 }
  0x29   : > { %p2047_p9 = scmp.ne.s32.totalorder %s2996_s2, %s2046_s11  ;;  %p2053_p4 = scmp.lt.u32.totalorder %s2046_s11, %s2996_s2 }
  0x2b   : > { %p2049_p2 = pnand %p2047_p9, %p2020_p13 }
  0x2d   : > { %p2050_p1 = pneg %p2049_p2 }
  0x2f   : > { %p2055_p6 = pnand %p2053_p4, %p2050_p1 }
  0x31   : > { %2058 = shalt.err (!%p2055_p6)
}
  0x32   : > { %s2059_s22 = scalar_lea.vmem %s2274_s24, 2048  ;;  %p2067_p3 = scmp.lt.s32.totalorder %s2274_s24, %s2274_s24 }
  0x33   : > { %p2060_p8 = scmp.ne.s32.totalorder %s2274_s24, %s2059_s22  ;;  %p2068_p5 = scmp.lt.s32.totalorder %s2059_s22, %s2059_s22 }
  0x35   : > { %p2062_p12 = pnand %p2060_p8, %p2020_p13  ;;  %p2069_p7 = por %p2068_p5, %p2067_p3 }
  0x37   : > { %p2063_p0 = pneg %p2062_p12 }
  0x39   : > { %p2070_p10 = pnand %p2069_p7, %p2063_p0 }
  0x3b   : > { %2073 = shalt.err (!%p2070_p10)
}
  0x3c   : > { %s2178_s27 = smov 512   ;;  %s2179_s28 = smov 32  }
  0x3d   : > { %1942 = dma.hbm_to_vmem [thread:$0]  (!%p2270_p11), %s2996_s2, 2048, %s2274_s24, [#allocation7], %s2178_s27, %s2178_s27, %s2179_s28  }
  0x3e   : > { %s2324_s4 = sadd.s32 1, %s2174_s15   ;;  %s27_s5 = sadd.s32 1, %s2170_s14 }
  0x3f   : > { %s24_s6 = ssub.s32 %s2174_s15, %s2324_s4  ;;  %p34_p13 = scmp.ne.s32.totalorder %s2170_s14, %s2166_s13 }
  0x40   : > { %p25_p9 = scmp.eq.s32.totalorder %s24_s6, 0  ;;  %p35_p2 = scmp.eq.s32.totalorder %s2174_s15, 0 }
  0x41   : > { %p3005_p1 = scmp.eq.s32.totalorder %s2242_s16, 1  ;;  %p1953_p6 = scmp.lt.s32.totalorder %s2174_s15, 2 }
  0x42   : > { %s2340_s8 = scalar_select %p25_p9, %s2170_s14, %s27_s5  }
  0x43   : > { %p2334_p4 = por %p3005_p1, %p34_p13  ;;  %p36_p8 = por %p35_p2, %p34_p13 }
  0x44   : > { %s156_s25 = sand.u32 1, %s2170_s14   ;;  %s1862_s24 = sshll.u32 %s2174_s15, 8 }
  0x45   : > { %s1843_s9 = sshll.u32 %s156_s25, 4  ;;  %s2347_s17 = scalar_lea.hbm %s2994_s0, %s1862_s24 }
  0x46   : > { %s160_s21 = scalar_lea.vmem [#allocation3], %s1843_s9  ;;  %p2351_p11 = pnand %p1953_p6, %p36_p8 }
  0x47   : > { %s168_s23 = sshll.u32 %s160_s21, 4  ;;  %s157_s22 = scalar_lea.sflag [#allocation4], %s156_s25  ;;  %s2349_s23 = int_to_ptr.vmem [resolvable:$true] %s168_s23 }
  0x48   : > { %s2074_s27 = scalar_lea.hbm %s2347_s17, 256  ;;  %p2076_p0 = pneg %p2351_p11 }
  0x49   : > { %p2075_p12 = scmp.ne.s32.totalorder %s2347_s17, %s2074_s27  ;;  %s2079_s30 = scalar_lea.hbm %s2994_s0, 512 }
  0x4a   : > { %p2080_p7 = scmp.lt.u32.totalorder %s2347_s17, %s2994_s0  ;;  %p2081_p10 = scmp.lt.u32.totalorder %s2079_s30, %s2074_s27 }
  0x4b   : > { %p2077_p3 = pnand %p2076_p0, %p2075_p12  ;;  %p2083_p9 = scmp.lt.u32.totalorder %s2074_s27, %s2347_s17 }
  0x4c   : > { %p2082_p13 = por %p2081_p10, %p2080_p7 }
  0x4d   : > { %p2078_p5 = pneg %p2077_p3 }
  0x4e   : > { %p2084_p2 = por %p2083_p9, %p2082_p13 }
  0x50   : > { %p2085_p1 = pnand %p2084_p2, %p2078_p5 }
  0x52   : > { %2088 = shalt.err (!%p2085_p1)
}
  0x53   : > { %s2089_s25 = scalar_lea.vmem %s2349_s23, 256  ;;  %s2180_s9 = smov [#allocation3]  }
  0x54   : > { %p2090_p6 = scmp.ne.s32.totalorder %s2349_s23, %s2089_s25  ;;  %s2094_s24 = sshll.u32 %s2180_s9, 4  ;;  %s2095_s24 = int_to_ptr.vmem [resolvable:$false] %s2094_s24 }
  0x55   : > { %s2096_s10 = scalar_lea.vmem %s2095_s24, 512  ;;  %p2097_p3 = scmp.lt.s32.totalorder %s2349_s23, %s2095_s24 }
  0x56   : > { %p2092_p8 = pnand %p2090_p6, %p2076_p0  ;;  %p2098_p7 = scmp.lt.s32.totalorder %s2096_s10, %s2089_s25 }
  0x58   : > { %p2093_p12 = pneg %p2092_p8  ;;  %p2099_p10 = por %p2098_p7, %p2097_p3 }
  0x5a   : > { %p2100_p13 = pnand %p2099_p10, %p2093_p12 }
  0x5c   : > { %2103 = shalt.err (!%p2100_p13)
}
  0x5d   : > { %1946 = dma.hbm_to_vmem [thread:$0]  (!%p2351_p11), %s2347_s17, 256, %s2349_s23, %s157_s22  }
  0x5e   : > { %p3008_p5 = scmp.ne.s32.totalorder %s3003_s20, 0 }
  0x5f   : > { %s2383_s11 = sand.u32 (!%p3008_p5), 1, %s2166_s13   ;;  %p3009_p0 = scmp.ne.s32.totalorder (!%p3008_p5), %s3001_s18, 0 }
  0x60   : > { %177 = sbr.rel (%p3008_p5) target bundleno = 929 (0x3a1), region = 32  ;;  %s1847_s21 = sshll.u32 (!%p3008_p5), %s2383_s11, 4 }
  0x61   : > { %s180_s27 = scalar_lea.sflag (!%p3008_p5), [#allocation4], %s2383_s11  ;;  %s183_s28 = scalar_lea.vmem (!%p3008_p5), [#allocation3], %s1847_s21 }
  0x67   : > { %2149 = dma.done.wait (%p3009_p0), %s180_s27, 256  }
  0x68   : > { %2151 = vsyncadd (%p3009_p0), %s180_s27, 4294967040  ;;  %p3010_p9 = scmp.eq.s32.totalorder %s2242_s16, 0 }
  0x6a   : > { %2153 = dma.done.wait (%p3010_p9), [#allocation7], 2176   ;;  %p3011_p11 = pmov %p3010_p9 }
  0x6b   : > { %v2395_v0 = vld [vmem:[%s183_s28] sm:$0xff]  ;;  %v2397_v1 = vld [vmem:[%s183_s28 + $0x8] sm:$0xff]  ;;  %s2181_s20 = smov 65   ;;  %s2182_s17 = smov 72   ;;  %v240_v5 = vlaneseq  ;;  %vm387_vm0 = vcmask 531456   ;;  %vm277_vm1 = vcmask 588800  }
  0x6c   : > { %2155 = vsyncadd (%p3011_p11), [#allocation7], 4294965120  ;;  %381 = vrot.lane.b32.xlu1 %v2395_v0, %s2181_s20  ;;  %933 = vst [vmem:[#allocation2 + $0xc8] sm:$0xf0] %v2395_v0  ;;  %271 = vrot.lane.b32.xlu0 %v2395_v0, %s2182_s17  ;;  %v2404_v2 = vcombine.high %v2395_v0, %v2395_v0  ;;  %v2411_v3 = vcombine.high %v2397_v1, %v2397_v1  ;;  %s2183_s18 = smov 73   ;;  %s2184_s23 = smov 71  }
  0x6d   : > { %935 = vst [vmem:[#allocation2 + $0xd8] sm:$0xf0] %v2397_v1  ;;  %s2185_s26 = smov 63   ;;  %s2186_s22 = smov 56   ;;  %v928_v4 = vcombine.low %v2395_v0, %v2395_v0  ;;  %v2468_v6 = vshrl.u32 %v240_v5, 7  ;;  %v929_v11 = vcombine.low %v2397_v1, %v2397_v1  ;;  %vm229_vm2 = vcmask 596992  }
  0x6e   : > { %s2187_s29 = smov 64   ;;  %s2188_s30 = smov 57   ;;  %v2483_v9 = vld [vmem:[#allocation8 + $0x3] ss:$8 sm:$0xf]  ;;  %vm338_vm3 = vcmask 580608  }
  0x6f   : > { %s2189_s5 = smov 9   ;;  %s2190_s6 = smov 7   ;;  %932 = vst [vmem:[#allocation2 + $0xc0] sm:$0xf0] %v928_v4  ;;  %v2475_v7 = vsub.s32 0, %v2468_v6  ;;  %v2478_v8 = vsub.s32 1, %v2468_v6 }
  0x70   : > { %383 = vrot.lane.b32.xlu1 %v2404_v2, %s2181_s20  ;;  %273 = vrot.lane.b32.xlu0 %v2404_v2, %s2182_s17  ;;  %s2191_s25 = smov 55   ;;  %s2192_s9 = smov 8   ;;  %v2485_v10 = vld [vmem:[#allocation8 + $0x45] ss:$8 sm:$0xf]  ;;  %v2494_v16 = vsub.s32 3, %v2468_v6 }
  0x71   : > { %s2193_s24 = smov 121   ;;  %s2194_s10 = smov 1   ;;  %v2489_v12 = vld [vmem:[#allocation8 + $0x1] ss:$8 sm:$0xf]  ;;  %v406_v17 = vrot.slane %v2483_v9, %v2478_v8  ;;  %v1267_v18 = vrot.slane %v2485_v10, %v2475_v7  ;;  %v402_v23 = vrot.slane %v2483_v9, %v2475_v7  ;;  %v2563_v62 = vsub.s32 2, %v2468_v6 }
  0x72   : > { %s2195_s21 = smov 127   ;;  %v2491_v13 = vld [vmem:[#allocation8 + $0x43] ss:$8 sm:$0xf]  ;;  %934 = vst [vmem:[#allocation2 + $0xd0] sm:$0xf0] %v929_v11  ;;  %v296_v19 = vrot.slane %v2489_v12, %v2478_v8  ;;  %v1279_v24 = vrot.slane %v2485_v10, %v2494_v16  ;;  %v292_v27 = vrot.slane %v2489_v12, %v2475_v7 }
  0x73   : > { %s2196_s27 = smov 119   ;;  %v1193_v20 = vrot.slane %v2491_v13, %v2475_v7  ;;  %v1205_v28 = vrot.slane %v2491_v13, %v2494_v16  ;;  %v2526_v33 = vld [vmem:[#allocation8] ss:$8 sm:$0xf]  ;;  %s2197_s28 = smov 120   ;;  %v1197_v5 = vrot.slane %v2491_v13, %v2478_v8  ;;  %vm497_vm4 = vcmask 515072  }
  0x74   : > { %378 = vrot.lane.b32.xlu1 %v2411_v3, %s2181_s20  ;;  %268 = vrot.lane.b32.xlu0 %v2411_v3, %s2182_s17  ;;  %v2528_v34 = vld [vmem:[#allocation8 + $0x42] ss:$8 sm:$0xf]  ;;  %v247_v43 = vrot.slane %v2526_v33, %v2478_v8  ;;  %v2550_v50 = vld [vmem:[#allocation8 + $0x44] ss:$8 sm:$0xf] }
  0x75   : > { %v1162_v44 = vrot.slane %v2528_v34, %v2475_v7  ;;  %v2546_v49 = vld [vmem:[#allocation8 + $0x2] ss:$8 sm:$0xf]  ;;  %v1236_v61 = vrot.slane %v2550_v50, %v2475_v7  ;;  %vm607_vm5 = vcmask 457728   ;;  %vm448_vm6 = vcmask 523264  }
  0x76   : > { %v357_v58 = vrot.slane %v2546_v49, %v2478_v8  ;;  %vm558_vm7 = vcmask 465920   ;;  %vm717_vm8 = vcmask 72704   ;;  %vm827_vm9 = vcmask 56320  }
  0x77   : > { %vm668_vm10 = vcmask 449536   ;;  %vm778_vm11 = vcmask 64512   ;;  %vm993_vm12 = vcmask 990208   ;;  %vm888_vm13 = vcmask 7168  }
  0x78   : > { %225 = vrot.lane.b32.xlu1 %v2404_v2, %s2183_s18  ;;  %223 = vrot.lane.b32.xlu0 %v2395_v0, %s2183_s18  ;;  %vm944_vm14 = vcmask 1039360   ;;  %vm1103_vm15 = vcmask 973824  }
  0x7c   : > { %334 = vrot.lane.b32.xlu1 %v2404_v2, %s2184_s23  ;;  %332 = vrot.lane.b32.xlu0 %v2395_v0, %s2184_s23 }
  0x80   : > { %275 = vrot.lane.b32.xlu1 %v2397_v1, %s2182_s17  ;;  %218 = vrot.lane.b32.xlu0 %v2411_v3, %s2183_s18  ;;  %s1863_s17 = sshll.u32 %s2242_s16, 9  ;;  %s1735_s16 = scalar_lea.sflag [#allocation5], %s2383_s11 }
  0x84   : > { %385 = vrot.lane.b32.xlu1 %v2397_v1, %s2181_s20  ;;  %329 = vrot.lane.b32.xlu0 %v2411_v3, %s2184_s23  ;;  %s1850_s20 = sshll.u32 %s2383_s11, 5 }
  0x88   : > { %493 = vrot.lane.b32.xlu1 %v2404_v2, %s2185_s26  ;;  %491 = vrot.lane.b32.xlu0 %v2395_v0, %s2185_s26 }
  0x8c   : > { %603 = vrot.lane.b32.xlu1 %v2404_v2, %s2186_s22  ;;  %601 = vrot.lane.b32.xlu0 %v2395_v0, %s2186_s22 }
  0x90   : > { %336 = vrot.lane.b32.xlu1 %v2397_v1, %s2184_s23  ;;  %227 = vrot.lane.b32.xlu0 %v2397_v1, %s2183_s18  ;;  %s213_s18 = scalar_lea.vmem [#allocation9], %s1850_s20 }
  0x91   : > { %s1749_s23 = sshll.u32 %s213_s18, 4  ;;  %s2952_s23 = int_to_ptr.vmem [resolvable:$true] %s1749_s23 }
  0x94   : > { %598 = vrot.lane.b32.xlu1 %v2411_v3, %s2186_s22  ;;  %488 = vrot.lane.b32.xlu0 %v2411_v3, %s2185_s26 }
  0x98   : > { %444 = vrot.lane.b32.xlu1 %v2404_v2, %s2187_s29  ;;  %442 = vrot.lane.b32.xlu0 %v2395_v0, %s2187_s29 }
  0x9c   : > { %554 = vrot.lane.b32.xlu1 %v2404_v2, %s2188_s30  ;;  %552 = vrot.lane.b32.xlu0 %v2395_v0, %s2188_s30 }
  0xa0   : > { %495 = vrot.lane.b32.xlu1 %v2397_v1, %s2185_s26  ;;  %439 = vrot.lane.b32.xlu0 %v2411_v3, %s2187_s29 }
  0xa4   : > { %605 = vrot.lane.b32.xlu1 %v2397_v1, %s2186_s22  ;;  %549 = vrot.lane.b32.xlu0 %v2411_v3, %s2188_s30 }
  0xa8   : > { %713 = vrot.lane.b32.xlu1 %v2404_v2, %s2189_s5  ;;  %711 = vrot.lane.b32.xlu0 %v2395_v0, %s2189_s5 }
  0xac   : > { %823 = vrot.lane.b32.xlu1 %v2404_v2, %s2190_s6  ;;  %821 = vrot.lane.b32.xlu0 %v2395_v0, %s2190_s6 }
  0xb0   : > { %556 = vrot.lane.b32.xlu1 %v2397_v1, %s2188_s30  ;;  %446 = vrot.lane.b32.xlu0 %v2397_v1, %s2187_s29  ;;  %s2950_s29 = scalar_lea.hbm %s2997_s3, %s1863_s17  ;;  %s2104_s30 = scalar_lea.vmem %s2952_s23, 512 }
  0xb1   : > { %p2105_p2 = scmp.ne.s32.totalorder %s2952_s23, %s2104_s30 }
  0xb3   : > { %p2106_p1 = pnand %p2105_p2, %p2334_p4 }
  0xb4   : > { %818 = vrot.lane.b32.xlu1 %v2411_v3, %s2190_s6  ;;  %708 = vrot.lane.b32.xlu0 %v2411_v3, %s2189_s5 }
  0xb5   : > { %p2107_p6 = pneg %p2106_p1 }
  0xb8   : > { %664 = vrot.lane.b32.xlu1 %v2404_v2, %s2191_s25  ;;  %662 = vrot.lane.b32.xlu0 %v2395_v0, %s2191_s25 }
  0xbc   : > { %774 = vrot.lane.b32.xlu1 %v2404_v2, %s2192_s9  ;;  %772 = vrot.lane.b32.xlu0 %v2395_v0, %s2192_s9 }
  0xc0   : > { %715 = vrot.lane.b32.xlu1 %v2397_v1, %s2189_s5  ;;  %659 = vrot.lane.b32.xlu0 %v2411_v3, %s2191_s25  ;;  %s2200_s5 = smov [#allocation9]  }
  0xc4   : > { %825 = vrot.lane.b32.xlu1 %v2397_v1, %s2190_s6  ;;  %769 = vrot.lane.b32.xlu0 %v2411_v3, %s2192_s9  ;;  %s2108_s6 = sshll.u32 %s2200_s5, 4  ;;  %s2109_s6 = int_to_ptr.vmem [resolvable:$false] %s2108_s6 }
  0xc5   : > { %p2111_p8 = scmp.lt.s32.totalorder %s2952_s23, %s2109_s6 }
  0xc8   : > { %989 = vrot.lane.b32.xlu1 %v2397_v1, %s2193_s24  ;;  %987 = vrot.lane.b32.xlu0 %v2404_v2, %s2193_s24 }
  0xcc   : > { %776 = vrot.lane.b32.xlu1 %v2397_v1, %s2192_s9  ;;  %666 = vrot.lane.b32.xlu0 %v2397_v1, %s2191_s25  ;;  %s2110_s25 = scalar_lea.vmem %s2109_s6, 1024 }
  0xcd   : > { %p2112_p12 = scmp.lt.s32.totalorder %s2110_s25, %s2104_s30 }
  0xcf   : > { %p2113_p3 = por %p2112_p12, %p2111_p8 }
  0xd0   : > { %882 = vrot.lane.b32.xlu1 %v2395_v0, %s2194_s10  ;;  %985 = vrot.lane.b32.xlu0 %v2395_v0, %s2193_s24 }
  0xd1   : > { %p2114_p7 = pnand %p2113_p3, %p2107_p6 }
  0xd4   : > { %938 = vrot.lane.b32.xlu1 %v2404_v2, %s2195_s21  ;;  %884 = vrot.lane.b32.xlu0 %v2404_v2, %s2194_s10 }
  0xd8   : > { %879 = vrot.lane.b32.xlu1 %v2411_v3, %s2194_s10  ;;  %940 = vrot.lane.b32.xlu0 %v2397_v1, %s2195_s21 }
  0xdc   : > { %991 = vrot.lane.b32.xlu1 %v2411_v3, %s2193_s24  ;;  %936 = vrot.lane.b32.xlu0 %v2395_v0, %s2195_s21 }
  0xde   : > { %v382_v14 = vpop.permute.xlu1 %381  ;;  %v272_v15 = vpop.permute.xlu0 %271 }
  0xe0   : > { %1099 = vrot.lane.b32.xlu1 %v2397_v1, %s2196_s27  ;;  %1097 = vrot.lane.b32.xlu0 %v2404_v2, %s2196_s27 }
  0xe2   : > { %v2508_v21 = vpop.permute.xlu1 %383  ;;  %v2510_v22 = vpop.permute.xlu0 %273 }
  0xe3   : > { %v388_v25 = vsel %vm387_vm0, %v382_v14, %v2508_v21  ;;  %v278_v26 = vsel %vm277_vm1, %v272_v15, %v2510_v22 }
  0xe4   : > { %v420_v29 = vmul.f32 %v406_v17, %v388_v25  ;;  %v1284_v30 = vmul.f32 %v1267_v18, %v388_v25  ;;  %v310_v31 = vmul.f32 %v296_v19, %v278_v26  ;;  %v1210_v32 = vmul.f32 %v1193_v20, %v278_v26  ;;  %942 = vrot.lane.b32.xlu1 %v2411_v3, %s2195_s21 }
  0xe5   : > { %886 = vrot.lane.b32.xlu0 %v2397_v1, %s2194_s10  ;;  %v1174_v17 = vrot.slane %v2528_v34, %v2494_v16  ;;  %v410_v18 = vrot.slane %v2483_v9, %v2563_v62 }
  0xe6   : > { %v428_v35 = vrot.slane %v420_v29, 4  ;;  %v1292_v36 = vrot.slane %v1284_v30, 4  ;;  %v318_v37 = vrot.slane %v310_v31, 4  ;;  %v1218_v38 = vrot.slane %v1210_v32, 4  ;;  %v2532_v39 = vpop.permute.xlu1 %378  ;;  %v2534_v40 = vpop.permute.xlu0 %268 }
  0xe7   : > { %v395_v41 = vsel %vm387_vm0, %v2532_v39, %v382_v14  ;;  %v285_v42 = vsel %vm277_vm1, %v2534_v40, %v272_v15  ;;  %v1201_v14 = vrot.slane %v2491_v13, %v2563_v62  ;;  %v243_v15 = vrot.slane %v2526_v33, %v2475_v7  ;;  %v2609_v31 = vld [vmem:[#allocation8 + $0x47] ss:$8 sm:$0xf] }
  0xe8   : > { %436 = vst [vmem:[#allocation2 + $0x28] sm:$0xf0] %v428_v35  ;;  %1300 = vst [vmem:[#allocation2 + $0x140] sm:$0xf0] %v1292_v36  ;;  %v419_v45 = vmul.f32 %v402_v23, %v395_v41  ;;  %v1287_v46 = vmul.f32 %v1279_v24, %v395_v41  ;;  %v309_v47 = vmul.f32 %v292_v27, %v285_v42  ;;  %1048 = vrot.lane.b32.xlu1 %v2404_v2, %s2197_s28 }
  0xe9   : > { %326 = vst [vmem:[#allocation2 + $0x8] sm:$0xf0] %v318_v37  ;;  %1226 = vst [vmem:[#allocation2 + $0x120] sm:$0xf0] %v1218_v38  ;;  %v1213_v48 = vmul.f32 %v1205_v28, %v285_v42  ;;  %1095 = vrot.lane.b32.xlu0 %v2395_v0, %s2196_s27  ;;  %v1275_v13 = vrot.slane %v2485_v10, %v2563_v62  ;;  %v353_v23 = vrot.slane %v2546_v49, %v2475_v7 }
  0xea   : > { %v427_v51 = vrot.slane %v419_v45, 4  ;;  %v1295_v52 = vrot.slane %v1287_v46, 4  ;;  %v317_v53 = vrot.slane %v309_v47, 4  ;;  %v2552_v55 = vpop.permute.xlu1 %225  ;;  %v224_v56 = vpop.permute.xlu0 %223  ;;  %v2599_v24 = vld [vmem:[#allocation8 + $0x5] ss:$8 sm:$0xf]  ;;  %v1248_v27 = vrot.slane %v2550_v50, %v2494_v16 }
  0xeb   : > { %v1221_v54 = vrot.slane %v1213_v48, 4  ;;  %v230_v57 = vsel %vm229_vm2, %v224_v56, %v2552_v55  ;;  %v1341_v46 = vrot.slane %v2609_v31, %v2475_v7 }
  0xec   : > { %435 = vst [vmem:[#allocation2 + $0x20] sm:$0xf0] %v427_v51  ;;  %1303 = vst [vmem:[#allocation2 + $0x158] sm:$0xf0] %v1295_v52  ;;  %v261_v59 = vmul.f32 %v247_v43, %v230_v57  ;;  %v1179_v60 = vmul.f32 %v1162_v44, %v230_v57  ;;  %1046 = vrot.lane.b32.xlu1 %v2395_v0, %s2197_s28  ;;  %v304_v0 = vrot.slane %v2489_v12, %v2494_v16 }
  0xed   : > { %325 = vst [vmem:[#allocation2] sm:$0xf0] %v317_v53  ;;  %1229 = vst [vmem:[#allocation2 + $0x138] sm:$0xf0] %v1221_v54  ;;  %1050 = vrot.lane.b32.xlu0 %v2397_v1, %s2197_s28  ;;  %v300_v1 = vrot.slane %v2489_v12, %v2563_v62  ;;  %v414_v12 = vrot.slane %v2483_v9, %v2494_v16 }
  0xee   : > { %265 = vst [vmem:[#allocation2 + $0x8] sm:$0xf] %v261_v59  ;;  %1183 = vst [vmem:[#allocation2 + $0x120] sm:$0xf] %v1179_v60  ;;  %v2567_v63 = vpop.permute.xlu1 %334  ;;  %v333_v2 = vpop.permute.xlu0 %332 }
  0xef   : > { %v339_v4 = vsel %vm338_vm3, %v333_v2, %v2567_v63  ;;  %v2623_v53 = vld [vmem:[#allocation8 + $0x7] ss:$8 sm:$0xf] }
  0xf0   : > { %v371_v11 = vmul.f32 %v357_v58, %v339_v4  ;;  %v1253_v6 = vmul.f32 %v1236_v61, %v339_v4  ;;  %1052 = vrot.lane.b32.xlu1 %v2411_v3, %s2197_s28 }
  0xf1   : > { %1101 = vrot.lane.b32.xlu0 %v2411_v3, %s2196_s27  ;;  %v1271_v3 = vrot.slane %v2485_v10, %v2478_v8 }
  0xf2   : > { %375 = vst [vmem:[#allocation2 + $0x28] sm:$0xf] %v371_v11  ;;  %1257 = vst [vmem:[#allocation2 + $0x140] sm:$0xf] %v1253_v6  ;;  %v276_v19 = vpop.permute.xlu1 %275  ;;  %v2589_v20 = vpop.permute.xlu0 %218 }
  0xf3   : > { %v279_v25 = vsel %vm277_vm1, %v2510_v22, %v276_v19  ;;  %v280_v26 = vsel %vm277_vm1, %v276_v19, %v2534_v40  ;;  %v237_v9 = vsel %vm229_vm2, %v2589_v20, %v224_v56  ;;  %v516_v22 = vrot.slane %v2599_v24, %v2478_v8 }
  0xf4   : > { %v311_v28 = vmul.f32 %v300_v1, %v279_v25  ;;  %v312_v29 = vmul.f32 %v304_v0, %v280_v26  ;;  %v1211_v10 = vmul.f32 %v1197_v5, %v279_v25  ;;  %v1212_v30 = vmul.f32 %v1201_v14, %v280_v26 }
  0xf5   : > { %v260_v32 = vmul.f32 %v243_v15, %v237_v9  ;;  %v1182_v35 = vmul.f32 %v1174_v17, %v237_v9  ;;  %v1485_v4 = vld [vmem:[#allocation2 + $0x8] sm:$0xff]  ;;  %v2198_v0 = vmov 0.0   ;;  %v626_v14 = vrot.slane %v2623_v53, %v2478_v8 }
  0xf6   : > { %v319_v36 = vrot.slane %v311_v28, 4  ;;  %v320_v37 = vrot.slane %v312_v29, 4  ;;  %v1219_v38 = vrot.slane %v1211_v10, 4  ;;  %v1220_v40 = vrot.slane %v1212_v30, 4  ;;  %v386_v41 = vpop.permute.xlu1 %385  ;;  %v2613_v42 = vpop.permute.xlu0 %329  ;;  %1621 = vmatprep.mubr.f32.mxu0 %v2198_v0  ;;  %1692 = vmatprep.mubr.f32.mxu1 %v2198_v0 }
  0xf7   : > { %264 = vst [vmem:[#allocation2] sm:$0xf] %v260_v32  ;;  %1186 = vst [vmem:[#allocation2 + $0x138] sm:$0xf] %v1182_v35  ;;  %v389_v43 = vsel %vm387_vm0, %v2508_v21, %v386_v41  ;;  %v390_v44 = vsel %vm387_vm0, %v386_v41, %v2532_v39  ;;  %v346_v45 = vsel %vm338_vm3, %v2613_v42, %v333_v2  ;;  %vm1054_vm0 = vcmask 982016  }
  0xf8   : > { %327 = vst [vmem:[#allocation2 + $0x10] sm:$0xf0] %v319_v36  ;;  %328 = vst [vmem:[#allocation2 + $0x18] sm:$0xf0] %v320_v37  ;;  %v421_v47 = vmul.f32 %v410_v18, %v389_v43  ;;  %v422_v48 = vmul.f32 %v414_v12, %v390_v44  ;;  %v1285_v51 = vmul.f32 %v1271_v3, %v389_v43  ;;  %vm1544_vm1 = vcmask 1043456  }
  0xf9   : > { %1227 = vst [vmem:[#allocation2 + $0x128] sm:$0xf0] %v1219_v38  ;;  %1228 = vst [vmem:[#allocation2 + $0x130] sm:$0xf0] %v1220_v40  ;;  %v1286_v52 = vmul.f32 %v1275_v13, %v390_v44  ;;  %v370_v21 = vmul.f32 %v353_v23, %v346_v45  ;;  %v1256_v54 = vmul.f32 %v1248_v27, %v346_v45  ;;  %v1489_v56 = vld [vmem:[#allocation2 + $0x28] sm:$0xff] }
  0xfa   : > { %v2625_v39 = vld [vmem:[#allocation8 + $0x61] ss:$8 sm:$0xf]  ;;  %v429_v57 = vrot.slane %v421_v47, 4  ;;  %v430_v58 = vrot.slane %v422_v48, 4  ;;  %v1293_v59 = vrot.slane %v1285_v51, 4  ;;  %v2627_v61 = vpop.permute.xlu1 %493  ;;  %v2629_v2 = vpop.permute.xlu0 %491  ;;  %v1864_v11 = vpack.c.bf16 %v1489_v56, %v1485_v4 }
  0xfb   : > { %v1294_v60 = vrot.slane %v1286_v52, 4  ;;  %374 = vst [vmem:[#allocation2 + $0x20] sm:$0xf] %v370_v21  ;;  %1260 = vst [vmem:[#allocation2 + $0x158] sm:$0xf] %v1256_v54  ;;  %v498_v5 = vsel %vm497_vm4, %v2629_v2, %v2627_v61  ;;  %v1415_v15 = vrot.slane %v2625_v39, %v2475_v7  ;;  %v361_v3 = vrot.slane %v2546_v49, %v2563_v62 }
  0xfc   : > { %437 = vst [vmem:[#allocation2 + $0x30] sm:$0xf0] %v429_v57  ;;  %438 = vst [vmem:[#allocation2 + $0x38] sm:$0xf0] %v430_v58  ;;  %v530_v6 = vmul.f32 %v516_v22, %v498_v5  ;;  %v1358_v1 = vmul.f32 %v1341_v46, %v498_v5  ;;  %1865 = vmatprep.subr.bf16.mxu0 %v1864_v11  ;;  %v365_v23 = vrot.slane %v2546_v49, %v2494_v16 }
  0xfd   : > { %1301 = vst [vmem:[#allocation2 + $0x148] sm:$0xf0] %v1293_v59  ;;  %1302 = vst [vmem:[#allocation2 + $0x150] sm:$0xf0] %v1294_v60  ;;  %v1240_v25 = vrot.slane %v2550_v50, %v2478_v8  ;;  %v1244_v26 = vrot.slane %v2550_v50, %v2563_v62  ;;  %v251_v28 = vrot.slane %v2526_v33, %v2563_v62 }
  0xfe   : > { %v538_v17 = vrot.slane %v530_v6, 4  ;;  %v1366_v18 = vrot.slane %v1358_v1, 4  ;;  %v2638_v19 = vpop.permute.xlu1 %603  ;;  %v602_v12 = vpop.permute.xlu0 %601  ;;  %v255_v29 = vrot.slane %v2526_v33, %v2494_v16  ;;  %v1166_v10 = vrot.slane %v2528_v34, %v2478_v8  ;;  %v2674_v48 = vld [vmem:[#allocation8 + $0x4] ss:$8 sm:$0xf] }
  0xff   : > { %v608_v13 = vsel %vm607_vm5, %v602_v12, %v2638_v19  ;;  %v1170_v49 = vrot.slane %v2528_v34, %v2563_v62  ;;  %v622_v30 = vrot.slane %v2623_v53, %v2475_v7  ;;  %v1427_v50 = vrot.slane %v2625_v39, %v2494_v16  ;;  %v2676_v51 = vld [vmem:[#allocation8 + $0x46] ss:$8 sm:$0xf]  ;;  %v2693_v1 = vld [vmem:[#allocation8 + $0x60] ss:$8 sm:$0xf] }
 0x100   : > { %546 = vst [vmem:[#allocation2 + $0x48] sm:$0xf0] %v538_v17  ;;  %1374 = vst [vmem:[#allocation2 + $0x160] sm:$0xf0] %v1366_v18  ;;  %v640_v9 = vmul.f32 %v626_v14, %v608_v13  ;;  %v1432_v27 = vmul.f32 %v1415_v15, %v608_v13  ;;  %v512_v37 = vrot.slane %v2599_v24, %v2475_v7  ;;  %v1484_v54 = vld [vmem:[#allocation2] sm:$0xff] }
 0x101   : > { %v1353_v33 = vrot.slane %v2609_v31, %v2494_v16  ;;  %v467_v59 = vrot.slane %v2674_v48, %v2478_v8  ;;  %v1310_v60 = vrot.slane %v2676_v51, %v2475_v7  ;;  %v2691_v6 = vld [vmem:[#allocation8 + $0x6] ss:$8 sm:$0xf] }
 0x102   : > { %v648_v32 = vrot.slane %v640_v9, 4  ;;  %v1440_v35 = vrot.slane %v1432_v27, 4  ;;  %v337_v22 = vpop.permute.xlu1 %336  ;;  %v228_v36 = vpop.permute.xlu0 %227  ;;  %v1488_v43 = vld [vmem:[#allocation2 + $0x20] sm:$0xff] }
 0x103   : > { %v340_v38 = vsel %vm338_vm3, %v2567_v63, %v337_v22  ;;  %v341_v34 = vsel %vm338_vm3, %v337_v22, %v2613_v42  ;;  %v231_v40 = vsel %vm229_vm2, %v2552_v55, %v228_v36  ;;  %v232_v41 = vsel %vm229_vm2, %v228_v36, %v2589_v20 }
 0x104   : > { %656 = vst [vmem:[#allocation2 + $0x68] sm:$0xf0] %v648_v32  ;;  %1448 = vst [vmem:[#allocation2 + $0x180] sm:$0xf0] %v1440_v35  ;;  %v372_v44 = vmul.f32 %v361_v3, %v340_v38  ;;  %v373_v45 = vmul.f32 %v365_v23, %v341_v34  ;;  %v1254_v46 = vmul.f32 %v1240_v25, %v340_v38  ;;  %vm2199_vm2 = vmmov 1  }
 0x105   : > { %v1255_v47 = vmul.f32 %v1244_v26, %v341_v34  ;;  %v262_v63 = vmul.f32 %v251_v28, %v231_v40  ;;  %v263_v52 = vmul.f32 %v255_v29, %v232_v41  ;;  %v1180_v42 = vmul.f32 %v1166_v10, %v231_v40  ;;  %vm2933_vm3 = vmpackc.low %vm1544_vm1, %vm2199_vm2 }
 0x106   : > { %v1181_v21 = vmul.f32 %v1170_v49, %v232_v41  ;;  %376 = vst [vmem:[#allocation2 + $0x30] sm:$0xf] %v372_v44  ;;  %377 = vst [vmem:[#allocation2 + $0x38] sm:$0xf] %v373_v45  ;;  %v1866_v55 = vpack.c.bf16 %v1488_v43, %v1484_v54  ;;  %v2678_v20 = vpop.permute.xlu1 %598  ;;  %v2680_v56 = vpop.permute.xlu0 %488  ;;  %v577_v25 = vrot.slane %v2691_v6, %v2478_v8 }
 0x107   : > { %1258 = vst [vmem:[#allocation2 + $0x148] sm:$0xf] %v1254_v46  ;;  %1259 = vst [vmem:[#allocation2 + $0x150] sm:$0xf] %v1255_v47  ;;  %v615_v57 = vsel %vm607_vm5, %v2678_v20, %v602_v12  ;;  %v505_v58 = vsel %vm497_vm4, %v2680_v56, %v2629_v2  ;;  %v1384_v26 = vrot.slane %v2693_v1, %v2475_v7 }
 0x108   : > { %266 = vst [vmem:[#allocation2 + $0x10] sm:$0xf] %v262_v63  ;;  %267 = vst [vmem:[#allocation2 + $0x18] sm:$0xf] %v263_v52  ;;  %1867 = vmatpush1.bf16.msra.mxu0 %v1866_v55  ;;  %v639_v4 = vmul.f32 %v622_v30, %v615_v57  ;;  %v1435_v0 = vmul.f32 %v1427_v50, %v615_v57  ;;  %v529_v5 = vmul.f32 %v512_v37, %v505_v58 }
 0x109   : > { %1184 = vst [vmem:[#allocation2 + $0x128] sm:$0xf] %v1180_v42  ;;  %1185 = vst [vmem:[#allocation2 + $0x130] sm:$0xf] %v1181_v21  ;;  %v1361_v11 = vmul.f32 %v1353_v33, %v505_v58  ;;  %v520_v30 = vrot.slane %v2599_v24, %v2563_v62  ;;  %v524_v22 = vrot.slane %v2599_v24, %v2494_v16 }
 0x10a   : > { %v647_v14 = vrot.slane %v639_v4, 4  ;;  %v1443_v15 = vrot.slane %v1435_v0, 4  ;;  %v537_v17 = vrot.slane %v529_v5, 4  ;;  %v2695_v2 = vpop.permute.xlu1 %444  ;;  %v443_v12 = vpop.permute.xlu0 %442  ;;  %v1345_v33 = vrot.slane %v2609_v31, %v2478_v8  ;;  %v2737_v55 = vld [vmem:[#allocation8 + $0x21] ss:$8 sm:$0xf] }
 0x10b   : > { %v1369_v18 = vrot.slane %v1361_v11, 4  ;;  %v449_v3 = vsel %vm448_vm6, %v443_v12, %v2695_v2  ;;  %v1349_v38 = vrot.slane %v2609_v31, %v2563_v62  ;;  %v463_v34 = vrot.slane %v2674_v48, %v2475_v7 }
 0x10c   : > { %655 = vst [vmem:[#allocation2 + $0x60] sm:$0xf0] %v647_v14  ;;  %1451 = vst [vmem:[#allocation2 + $0x198] sm:$0xf0] %v1443_v15  ;;  %v481_v13 = vmul.f32 %v467_v59, %v449_v3  ;;  %v1327_v23 = vmul.f32 %v1310_v60, %v449_v3  ;;  %v1322_v40 = vrot.slane %v2676_v51, %v2494_v16 }
 0x10d   : > { %545 = vst [vmem:[#allocation2 + $0x40] sm:$0xf0] %v537_v17  ;;  %1377 = vst [vmem:[#allocation2 + $0x178] sm:$0xf0] %v1369_v18  ;;  %v1491_v9 = vld [vmem:[#allocation2 + $0x38] sm:$0xff]  ;;  %v1490_v27 = vld [vmem:[#allocation2 + $0x30] sm:$0xff]  ;;  %v630_v43 = vrot.slane %v2623_v53, %v2563_v62  ;;  %v634_v44 = vrot.slane %v2623_v53, %v2494_v16  ;;  %v1419_v31 = vrot.slane %v2625_v39, %v2478_v8 }
 0x10e   : > { %485 = vst [vmem:[#allocation2 + $0x48] sm:$0xf] %v481_v13  ;;  %1331 = vst [vmem:[#allocation2 + $0x160] sm:$0xf] %v1327_v23  ;;  %v2703_v28 = vpop.permute.xlu1 %554  ;;  %v553_v29 = vpop.permute.xlu0 %552  ;;  %v1423_v45 = vrot.slane %v2625_v39, %v2563_v62  ;;  %v573_v52 = vrot.slane %v2691_v6, %v2475_v7  ;;  %v736_v15 = vrot.slane %v2737_v55, %v2478_v8 }
 0x10f   : > { %v1487_v10 = vld [vmem:[#allocation2 + $0x18] sm:$0xff]  ;;  %v1486_v49 = vld [vmem:[#allocation2 + $0x10] sm:$0xff]  ;;  %v559_v50 = vsel %vm558_vm7, %v553_v29, %v2703_v28 }
 0x110   : > { %v1894_v32 = vpack.c.bf16 %v1491_v9, %v1487_v10  ;;  %v1896_v35 = vpack.c.bf16 %v1490_v27, %v1486_v49  ;;  %v591_v36 = vmul.f32 %v577_v25, %v559_v50  ;;  %v1401_v37 = vmul.f32 %v1384_v26, %v559_v50 }
 0x112   : > { %1895 = vmatprep.subr.bf16.mxu1 %v1894_v32  ;;  %595 = vst [vmem:[#allocation2 + $0x68] sm:$0xf] %v591_v36  ;;  %1405 = vst [vmem:[#allocation2 + $0x180] sm:$0xf] %v1401_v37  ;;  %v496_v41 = vpop.permute.xlu1 %495  ;;  %v2719_v24 = vpop.permute.xlu0 %439 }
 0x113   : > { %1897 = vmatpush1.bf16.msra.mxu1 %v1896_v35  ;;  %v499_v46 = vsel %vm497_vm4, %v2627_v61, %v496_v41  ;;  %v500_v47 = vsel %vm497_vm4, %v496_v41, %v2680_v56  ;;  %v456_v63 = vsel %vm448_vm6, %v2719_v24, %v443_v12  ;;  %v1396_v61 = vrot.slane %v2693_v1, %v2494_v16 }
 0x114   : > { %v531_v42 = vmul.f32 %v520_v30, %v499_v46  ;;  %v532_v53 = vmul.f32 %v524_v22, %v500_v47  ;;  %v1359_v21 = vmul.f32 %v1345_v33, %v499_v46  ;;  %v1360_v54 = vmul.f32 %v1349_v38, %v500_v47 }
 0x115   : > { %v480_v57 = vmul.f32 %v463_v34, %v456_v63  ;;  %v1330_v39 = vmul.f32 %v1322_v40, %v456_v63  ;;  %v1493_v49 = vld [vmem:[#allocation2 + $0x48] sm:$0xff]  ;;  %v581_v38 = vrot.slane %v2691_v6, %v2563_v62  ;;  %v585_v40 = vrot.slane %v2691_v6, %v2494_v16 }
 0x116   : > { %v539_v58 = vrot.slane %v531_v42, 4  ;;  %v540_v56 = vrot.slane %v532_v53, 4  ;;  %v1367_v59 = vrot.slane %v1359_v21, 4  ;;  %v1368_v60 = vrot.slane %v1360_v54, 4  ;;  %v606_v4 = vpop.permute.xlu1 %605  ;;  %v550_v0 = vpop.permute.xlu0 %549 }
 0x117   : > { %484 = vst [vmem:[#allocation2 + $0x40] sm:$0xf] %v480_v57  ;;  %1334 = vst [vmem:[#allocation2 + $0x178] sm:$0xf] %v1330_v39  ;;  %v609_v5 = vsel %vm607_vm5, %v2638_v19, %v606_v4  ;;  %v610_v11 = vsel %vm607_vm5, %v606_v4, %v2678_v20  ;;  %v566_v14 = vsel %vm558_vm7, %v550_v0, %v553_v29  ;;  %vm1540_vm4 = vcmask 883712  }
 0x118   : > { %547 = vst [vmem:[#allocation2 + $0x50] sm:$0xf0] %v539_v58  ;;  %548 = vst [vmem:[#allocation2 + $0x58] sm:$0xf0] %v540_v56  ;;  %v641_v17 = vmul.f32 %v630_v43, %v609_v5  ;;  %v642_v18 = vmul.f32 %v634_v44, %v610_v11  ;;  %v1433_v12 = vmul.f32 %v1419_v31, %v609_v5 }
 0x119   : > { %1375 = vst [vmem:[#allocation2 + $0x168] sm:$0xf0] %v1367_v59  ;;  %1376 = vst [vmem:[#allocation2 + $0x170] sm:$0xf0] %v1368_v60  ;;  %v1434_v3 = vmul.f32 %v1423_v45, %v610_v11  ;;  %v590_v13 = vmul.f32 %v573_v52, %v566_v14  ;;  %v1404_v23 = vmul.f32 %v1396_v61, %v566_v14  ;;  %v1497_v25 = vld [vmem:[#allocation2 + $0x68] sm:$0xff] }
 0x11a   : > { %v2748_v19 = vld [vmem:[#allocation8 + $0x23] ss:$8 sm:$0xf]  ;;  %v649_v26 = vrot.slane %v641_v17, 4  ;;  %v650_v20 = vrot.slane %v642_v18, 4  ;;  %v1441_v9 = vrot.slane %v1433_v12, 4  ;;  %v2750_v29 = vpop.permute.xlu1 %713  ;;  %v2752_v10 = vpop.permute.xlu0 %711  ;;  %v1868_v50 = vpack.c.bf16 %v1497_v25, %v1493_v49 }
 0x11b   : > { %v1442_v27 = vrot.slane %v1434_v3, 4  ;;  %594 = vst [vmem:[#allocation2 + $0x60] sm:$0xf] %v590_v13  ;;  %1408 = vst [vmem:[#allocation2 + $0x198] sm:$0xf] %v1404_v23  ;;  %v718_v30 = vsel %vm717_vm8, %v2752_v10, %v2750_v29  ;;  %v846_v35 = vrot.slane %v2748_v19, %v2478_v8  ;;  %v1388_v41 = vrot.slane %v2693_v1, %v2478_v8 }
 0x11c   : > { %657 = vst [vmem:[#allocation2 + $0x70] sm:$0xf0] %v649_v26  ;;  %658 = vst [vmem:[#allocation2 + $0x78] sm:$0xf0] %v650_v20  ;;  %v750_v32 = vmul.f32 %v736_v15, %v718_v30  ;;  %1869 = vmatprep.subr.bf16.mxu0 %v1868_v50  ;;  %v1392_v43 = vrot.slane %v2693_v1, %v2563_v62  ;;  %v471_v44 = vrot.slane %v2674_v48, %v2563_v62 }
 0x11d   : > { %1449 = vst [vmem:[#allocation2 + $0x188] sm:$0xf0] %v1441_v9  ;;  %1450 = vst [vmem:[#allocation2 + $0x190] sm:$0xf0] %v1442_v27  ;;  %v475_v31 = vrot.slane %v2674_v48, %v2494_v16  ;;  %v1314_v45 = vrot.slane %v2676_v51, %v2478_v8  ;;  %v1318_v46 = vrot.slane %v2676_v51, %v2563_v62 }
 0x11e   : > { %v758_v22 = vrot.slane %v750_v32, 4  ;;  %v2759_v36 = vpop.permute.xlu1 %823  ;;  %v822_v37 = vpop.permute.xlu0 %821  ;;  %v842_v52 = vrot.slane %v2748_v19, %v2475_v7  ;;  %v732_v1 = vrot.slane %v2737_v55, %v2475_v7  ;;  %v2790_v58 = vld [vmem:[#allocation8 + $0x20] ss:$8 sm:$0xf] }
 0x11f   : > { %v828_v33 = vsel %vm827_vm9, %v822_v37, %v2759_v36  ;;  %v1492_v4 = vld [vmem:[#allocation2 + $0x40] sm:$0xff]  ;;  %v687_v18 = vrot.slane %v2790_v58, %v2478_v8 }
 0x120   : > { %766 = vst [vmem:[#allocation2 + $0x88] sm:$0xf0] %v758_v22  ;;  %v860_v34 = vmul.f32 %v846_v35, %v828_v33  ;;  %v2804_v3 = vld [vmem:[#allocation8 + $0x22] ss:$8 sm:$0xf] }
 0x122   : > { %v868_v47 = vrot.slane %v860_v34, 4  ;;  %v557_v6 = vpop.permute.xlu1 %556  ;;  %v447_v63 = vpop.permute.xlu0 %446  ;;  %v1496_v21 = vld [vmem:[#allocation2 + $0x60] sm:$0xff]  ;;  %v740_v34 = vrot.slane %v2737_v55, %v2563_v62 }
 0x123   : > { %v560_v42 = vsel %vm558_vm7, %v2703_v28, %v557_v6  ;;  %v561_v48 = vsel %vm558_vm7, %v557_v6, %v550_v0  ;;  %v450_v53 = vsel %vm448_vm6, %v2695_v2, %v447_v63  ;;  %v451_v51 = vsel %vm448_vm6, %v447_v63, %v2719_v24  ;;  %v2792_v0 = vld [vmem:[#allocation8 + $0x62] ss:$8 sm:$0xf] }
 0x124   : > { %876 = vst [vmem:[#allocation2 + $0xa8] sm:$0xf0] %v868_v47  ;;  %v592_v54 = vmul.f32 %v581_v38, %v560_v42  ;;  %v593_v57 = vmul.f32 %v585_v40, %v561_v48  ;;  %v1402_v39 = vmul.f32 %v1388_v41, %v560_v42  ;;  %v1403_v61 = vmul.f32 %v1392_v43, %v561_v48 }
 0x125   : > { %v482_v56 = vmul.f32 %v471_v44, %v450_v53  ;;  %v483_v59 = vmul.f32 %v475_v31, %v451_v51  ;;  %v1328_v60 = vmul.f32 %v1314_v45, %v450_v53  ;;  %v1329_v28 = vmul.f32 %v1318_v46, %v451_v51  ;;  %v2834_v51 = vld [vmem:[#allocation8 + $0x27] ss:$8 sm:$0xf] }
 0x126   : > { %596 = vst [vmem:[#allocation2 + $0x70] sm:$0xf] %v592_v54  ;;  %597 = vst [vmem:[#allocation2 + $0x78] sm:$0xf] %v593_v57  ;;  %v1870_v2 = vpack.c.bf16 %v1496_v21, %v1492_v4  ;;  %v2794_v24 = vpop.permute.xlu1 %818  ;;  %v709_v5 = vpop.permute.xlu0 %708  ;;  %v1458_v12 = vrot.slane %v2792_v0, %v2475_v7  ;;  %v744_v41 = vrot.slane %v2737_v55, %v2494_v16 }
 0x127   : > { %1406 = vst [vmem:[#allocation2 + $0x188] sm:$0xf] %v1402_v39  ;;  %1407 = vst [vmem:[#allocation2 + $0x190] sm:$0xf] %v1403_v61  ;;  %v835_v11 = vsel %vm827_vm9, %v2794_v24, %v822_v37  ;;  %v725_v14 = vsel %vm717_vm8, %v709_v5, %v2752_v10  ;;  %v797_v10 = vrot.slane %v2804_v3, %v2478_v8 }
 0x128   : > { %486 = vst [vmem:[#allocation2 + $0x50] sm:$0xf] %v482_v56  ;;  %487 = vst [vmem:[#allocation2 + $0x58] sm:$0xf] %v483_v59  ;;  %1871 = vmatpush1.bf16.msra.mxu0 %v1870_v2  ;;  %v859_v15 = vmul.f32 %v842_v52, %v835_v11  ;;  %v749_v17 = vmul.f32 %v732_v1, %v725_v14  ;;  %v683_v43 = vrot.slane %v2790_v58, %v2475_v7 }
 0x129   : > { %1332 = vst [vmem:[#allocation2 + $0x168] sm:$0xf] %v1328_v60  ;;  %1333 = vst [vmem:[#allocation2 + $0x170] sm:$0xf] %v1329_v28  ;;  %v1470_v44 = vrot.slane %v2792_v0, %v2494_v16  ;;  %v850_v46 = vrot.slane %v2748_v19, %v2563_v62  ;;  %v854_v47 = vrot.slane %v2748_v19, %v2494_v16 }
 0x12a   : > { %v867_v13 = vrot.slane %v859_v15, 4  ;;  %v757_v23 = vrot.slane %v749_v17, 4  ;;  %v2806_v25 = vpop.permute.xlu1 %664  ;;  %v663_v26 = vpop.permute.xlu0 %662  ;;  %v793_v52 = vrot.slane %v2804_v3, %v2475_v7  ;;  %v1013_v28 = vrot.slane %v2834_v51, %v2478_v8 }
 0x12b   : > { %v669_v20 = vsel %vm668_vm10, %v663_v26, %v2806_v25  ;;  %v801_v17 = vrot.slane %v2804_v3, %v2563_v62 }
 0x12c   : > { %875 = vst [vmem:[#allocation2 + $0xa0] sm:$0xf0] %v867_v13  ;;  %765 = vst [vmem:[#allocation2 + $0x80] sm:$0xf0] %v757_v23  ;;  %v701_v9 = vmul.f32 %v687_v18, %v669_v20  ;;  %v1475_v27 = vmul.f32 %v1458_v12, %v669_v20  ;;  %v805_v12 = vrot.slane %v2804_v3, %v2494_v16 }
 0x12d   : > { %v1499_v49 = vld [vmem:[#allocation2 + $0x78] sm:$0xff]  ;;  %v1498_v30 = vld [vmem:[#allocation2 + $0x70] sm:$0xff]  ;;  %v691_v13 = vrot.slane %v2790_v58, %v2563_v62  ;;  %v695_v23 = vrot.slane %v2790_v58, %v2494_v16  ;;  %v1466_v20 = vrot.slane %v2792_v0, %v2563_v62 }
 0x12e   : > { %705 = vst [vmem:[#allocation2 + $0x88] sm:$0xf] %v701_v9  ;;  %1479 = vst [vmem:[#allocation2 + $0x1a0] sm:$0xf] %v1475_v27  ;;  %v2812_v50 = vpop.permute.xlu1 %774  ;;  %v773_v32 = vpop.permute.xlu0 %772 }
 0x12f   : > { %v1495_v35 = vld [vmem:[#allocation2 + $0x58] sm:$0xff]  ;;  %v1494_v22 = vld [vmem:[#allocation2 + $0x50] sm:$0xff]  ;;  %v779_v37 = vsel %vm778_vm11, %v773_v32, %v2812_v50 }
 0x130   : > { %v1898_v33 = vpack.c.bf16 %v1499_v49, %v1495_v35  ;;  %v1900_v38 = vpack.c.bf16 %v1498_v30, %v1494_v22  ;;  %v811_v40 = vmul.f32 %v797_v10, %v779_v37  ;;  %v1009_v49 = vrot.slane %v2834_v51, %v2475_v7 }
 0x132   : > { %1899 = vmatprep.subr.bf16.mxu1 %v1898_v33  ;;  %815 = vst [vmem:[#allocation2 + $0xa8] sm:$0xf] %v811_v40  ;;  %v716_v31 = vpop.permute.xlu1 %715  ;;  %v660_v45 = vpop.permute.xlu0 %659 }
 0x133   : > { %1901 = vmatpush1.bf16.msra.mxu1 %v1900_v38  ;;  %v719_v55 = vsel %vm717_vm8, %v2750_v29, %v716_v31  ;;  %v720_v6 = vsel %vm717_vm8, %v716_v31, %v709_v5  ;;  %v676_v63 = vsel %vm668_vm10, %v660_v45, %v663_v26  ;;  %v1462_v26 = vrot.slane %v2792_v0, %v2478_v8 }
 0x134   : > { %v751_v1 = vmul.f32 %v740_v34, %v719_v55  ;;  %v752_v42 = vmul.f32 %v744_v41, %v720_v6  ;;  %v700_v48 = vmul.f32 %v683_v43, %v676_v63  ;;  %v1478_v53 = vmul.f32 %v1470_v44, %v676_v63  ;;  %v2867_v41 = vld [vmem:[#allocation8 + $0x24] ss:$8 sm:$0xf] }
 0x135   : > { %v1501_v4 = vld [vmem:[#allocation2 + $0x88] sm:$0xff] }
 0x136   : > { %v759_v21 = vrot.slane %v751_v1, 4  ;;  %v760_v54 = vrot.slane %v752_v42, 4  ;;  %704 = vst [vmem:[#allocation2 + $0x80] sm:$0xf] %v700_v48  ;;  %1482 = vst [vmem:[#allocation2 + $0x1b8] sm:$0xf] %v1478_v53  ;;  %v826_v19 = vpop.permute.xlu1 %825  ;;  %v770_v57 = vpop.permute.xlu0 %769  ;;  %v903_v1 = vrot.slane %v2867_v41, %v2475_v7 }
 0x137   : > { %v829_v29 = vsel %vm827_vm9, %v2759_v36, %v826_v19  ;;  %v830_v39 = vsel %vm827_vm9, %v826_v19, %v2794_v24  ;;  %v786_v61 = vsel %vm778_vm11, %v770_v57, %v773_v32 }
 0x138   : > { %767 = vst [vmem:[#allocation2 + $0x90] sm:$0xf0] %v759_v21  ;;  %768 = vst [vmem:[#allocation2 + $0x98] sm:$0xf0] %v760_v54  ;;  %v861_v56 = vmul.f32 %v850_v46, %v829_v29  ;;  %v862_v59 = vmul.f32 %v854_v47, %v830_v39  ;;  %v810_v60 = vmul.f32 %v793_v52, %v786_v61 }
 0x139   : > { %v1505_v2 = vld [vmem:[#allocation2 + $0xa8] sm:$0xff] }
 0x13a   : > { %v869_v5 = vrot.slane %v861_v56, 4  ;;  %v870_v11 = vrot.slane %v862_v59, 4  ;;  %814 = vst [vmem:[#allocation2 + $0xa0] sm:$0xf] %v810_v60  ;;  %v2843_v36 = vpop.permute.xlu1 %989  ;;  %v988_v14 = vpop.permute.xlu0 %987  ;;  %v1872_v24 = vpack.c.bf16 %v1505_v2, %v1501_v4  ;;  %v1017_v59 = vrot.slane %v2834_v51, %v2563_v62 }
 0x13b   : > { %v995_v15 = vsel %vm993_vm12, %v988_v14, %v2843_v36  ;;  %v2872_v46 = vld [vmem:[#allocation8 + $0x26] ss:$8 sm:$0xf]  ;;  %v1021_v4 = vrot.slane %v2834_v51, %v2494_v16 }
 0x13c   : > { %877 = vst [vmem:[#allocation2 + $0xb0] sm:$0xf0] %v869_v5  ;;  %878 = vst [vmem:[#allocation2 + $0xb8] sm:$0xf0] %v870_v11  ;;  %v1027_v18 = vmul.f32 %v1013_v28, %v995_v15  ;;  %1873 = vmatprep.subr.bf16.mxu0 %v1872_v24  ;;  %v964_v42 = vrot.slane %v2872_v46, %v2478_v8  ;;  %v960_v2 = vrot.slane %v2872_v46, %v2475_v7 }
 0x13d   : > { %v1500_v34 = vld [vmem:[#allocation2 + $0x80] sm:$0xff] }
 0x13e   : > { %v1035_v9 = vrot.slane %v1027_v18, 4  ;;  %v777_v27 = vpop.permute.xlu1 %776  ;;  %v667_v10 = vpop.permute.xlu0 %666  ;;  %v2890_v5 = vld [vmem:[#allocation8 + $0x41] ss:$8 sm:$0xf] }
 0x13f   : > { %v780_v3 = vsel %vm778_vm11, %v2812_v50, %v777_v27  ;;  %v781_v30 = vsel %vm778_vm11, %v777_v27, %v770_v57  ;;  %v670_v58 = vsel %vm668_vm10, %v2806_v25, %v667_v10  ;;  %v671_v32 = vsel %vm668_vm10, %v667_v10, %v660_v45 }
 0x140   : > { %1043 = vst [vmem:[#allocation2 + $0xe8] sm:$0xf0] %v1035_v9  ;;  %v812_v35 = vmul.f32 %v801_v17, %v780_v3  ;;  %v813_v22 = vmul.f32 %v805_v12, %v781_v30  ;;  %v702_v0 = vmul.f32 %v691_v13, %v670_v58  ;;  %v703_v37 = vmul.f32 %v695_v23, %v671_v32 }
 0x141   : > { %v1476_v33 = vmul.f32 %v1462_v26, %v670_v58  ;;  %v1477_v38 = vmul.f32 %v1466_v20, %v671_v32  ;;  %v1504_v40 = vld [vmem:[#allocation2 + $0xa0] sm:$0xff]  ;;  %v907_v45 = vrot.slane %v2867_v41, %v2478_v8  ;;  %v1123_v13 = vrot.slane %v2890_v5, %v2478_v8 }
 0x142   : > { %816 = vst [vmem:[#allocation2 + $0xb0] sm:$0xf] %v812_v35  ;;  %817 = vst [vmem:[#allocation2 + $0xb8] sm:$0xf] %v813_v22  ;;  %v883_v50 = vpop.permute.xlu1 %882  ;;  %v986_v43 = vpop.permute.xlu0 %985  ;;  %v1874_v25 = vpack.c.bf16 %v1504_v40, %v1500_v34  ;;  %v968_v10 = vrot.slane %v2872_v46, %v2563_v62  ;;  %v911_v3 = vrot.slane %v2867_v41, %v2563_v62 }
 0x143   : > { %706 = vst [vmem:[#allocation2 + $0x90] sm:$0xf] %v702_v0  ;;  %707 = vst [vmem:[#allocation2 + $0x98] sm:$0xf] %v703_v37  ;;  %v994_v44 = vsel %vm993_vm12, %v986_v43, %v988_v14  ;;  %v915_v30 = vrot.slane %v2867_v41, %v2494_v16 }
 0x144   : > { %1480 = vst [vmem:[#allocation2 + $0x1a8] sm:$0xf] %v1476_v33  ;;  %1481 = vst [vmem:[#allocation2 + $0x1b0] sm:$0xf] %v1477_v38  ;;  %v1026_v31 = vmul.f32 %v1009_v49, %v994_v44  ;;  %1875 = vmatpush1.bf16.msra.mxu0 %v1874_v25  ;;  %v972_v49 = vrot.slane %v2872_v46, %v2494_v16  ;;  %v1119_v44 = vrot.slane %v2890_v5, %v2475_v7 }
 0x145   : > { %v1065_v46 = vld [vmem:[#allocation8 + $0x40] ss:$8 sm:$0xf] }
 0x146   : > { %v1034_v47 = vrot.slane %v1026_v31, 4  ;;  %v939_v55 = vpop.permute.xlu1 %938  ;;  %v2874_v6 = vpop.permute.xlu0 %884 }
 0x147   : > { %v889_v63 = vsel %vm888_vm13, %v883_v50, %v2874_v6 }
 0x148   : > { %1042 = vst [vmem:[#allocation2 + $0xe0] sm:$0xf0] %v1034_v47  ;;  %v921_v52 = vmul.f32 %v907_v45, %v889_v63 }
 0x149   : > { %v1507_v53 = vld [vmem:[#allocation2 + $0xb8] sm:$0xff]  ;;  %v1506_v29 = vld [vmem:[#allocation2 + $0xb0] sm:$0xff] }
 0x14a   : > { %v1503_v48 = vld [vmem:[#allocation2 + $0x98] sm:$0xff]  ;;  %v1502_v21 = vld [vmem:[#allocation2 + $0x90] sm:$0xff]  ;;  %925 = vst [vmem:[#allocation2 + $0xc8] sm:$0xf] %v921_v52  ;;  %v880_v54 = vpop.permute.xlu1 %879  ;;  %v941_v19 = vpop.permute.xlu0 %940  ;;  %v1070_v52 = vrot.slane %v1065_v46, %v2475_v7  ;;  %v1127_v7 = vrot.slane %v2890_v5, %v2563_v62 }
 0x14b   : > { %v1902_v57 = vpack.c.bf16 %v1507_v53, %v1503_v48  ;;  %v896_v39 = vsel %vm888_vm13, %v880_v54, %v883_v50  ;;  %v946_v61 = vsel %vm944_vm14, %v939_v55, %v941_v19  ;;  %v1904_v56 = vpack.c.bf16 %v1506_v29, %v1502_v21 }
 0x14c   : > { %v920_v60 = vmul.f32 %v903_v1, %v896_v39  ;;  %v978_v28 = vmul.f32 %v964_v42, %v946_v61  ;;  %v1074_v42 = vrot.slane %v1065_v46, %v2478_v8  ;;  %v1078_v29 = vrot.slane %v1065_v46, %v2563_v62 }
 0x14d   : > { %1903 = vmatprep.subr.bf16.mxu1 %v1902_v57  ;;  %v1082_v39 = vrot.slane %v1065_v46, %v2494_v16  ;;  %v1131_v8 = vrot.slane %v2890_v5, %v2494_v16  ;;  %v1530_v46 = vld [vmem:[#allocation2 + $0x170] sm:$0xff] }
 0x14e   : > { %1905 = vmatpush1.bf16.msra.mxu1 %v1904_v56  ;;  %924 = vst [vmem:[#allocation2 + $0xc0] sm:$0xf] %v920_v60  ;;  %982 = vst [vmem:[#allocation2 + $0xe8] sm:$0xf] %v978_v28  ;;  %v992_v11 = vpop.permute.xlu1 %991  ;;  %v937_v14 = vpop.permute.xlu0 %936 }
 0x14f   : > { %v996_v24 = vsel %vm993_vm12, %v2843_v36, %v992_v11  ;;  %v1002_v15 = vsel %vm993_vm12, %v992_v11, %v986_v43  ;;  %v945_v17 = vsel %vm944_vm14, %v937_v14, %v939_v55 }
 0x150   : > { %v1028_v18 = vmul.f32 %v1017_v59, %v996_v24  ;;  %v1029_v51 = vmul.f32 %v1021_v4, %v1002_v15  ;;  %v977_v12 = vmul.f32 %v960_v2, %v945_v17 }
 0x151   : > { %v1509_v58 = vld [vmem:[#allocation2 + $0xc8] sm:$0xff] }
 0x152   : > { %v1036_v23 = vrot.slane %v1028_v18, 4  ;;  %v1037_v26 = vrot.slane %v1029_v51, 4  ;;  %981 = vst [vmem:[#allocation2 + $0xe0] sm:$0xf] %v977_v12  ;;  %v2898_v20 = vpop.permute.xlu1 %1099  ;;  %v1098_v9 = vpop.permute.xlu0 %1097 }
 0x153   : > { %v1105_v36 = vsel %vm1103_vm15, %v1098_v9, %v2898_v20 }
 0x154   : > { %1044 = vst [vmem:[#allocation2 + $0xf0] sm:$0xf0] %v1036_v23  ;;  %1045 = vst [vmem:[#allocation2 + $0xf8] sm:$0xf0] %v1037_v26  ;;  %v1137_v27 = vmul.f32 %v1123_v13, %v1105_v36  ;;  %v1520_v26 = vld [vmem:[#allocation2 + $0x120] sm:$0xff]  ;;  %v1521_v36 = vld [vmem:[#allocation2 + $0x128] sm:$0xff] }
 0x155   : > { %v1513_v32 = vld [vmem:[#allocation2 + $0xe8] sm:$0xff]  ;;  %v1508_v31 = vld [vmem:[#allocation2 + $0xc0] sm:$0xff] }
 0x156   : > { %v1145_v35 = vrot.slane %v1137_v27, 4  ;;  %v943_v22 = vpop.permute.xlu1 %942  ;;  %v1876_v0 = vpack.c.bf16 %v1513_v32, %v1509_v58  ;;  %v1524_v58 = vld [vmem:[#allocation2 + $0x140] sm:$0xff]  ;;  %v1537_v32 = vld [vmem:[#allocation2 + $0x1a8] sm:$0xf] }
 0x157   : > { %v947_v37 = vsel %vm944_vm14, %v941_v19, %v943_v22  ;;  %v953_v33 = vsel %vm944_vm14, %v943_v22, %v937_v14  ;;  %v887_v38 = vpop.permute.xlu0 %886  ;;  %v1523_v22 = vld [vmem:[#allocation2 + $0x138] sm:$0xff] }
 0x158   : > { %1153 = vst [vmem:[#allocation2 + $0x108] sm:$0xf0] %v1145_v35  ;;  %v979_v34 = vmul.f32 %v968_v10, %v947_v37  ;;  %v980_v40 = vmul.f32 %v972_v49, %v953_v33  ;;  %v890_v50 = vsel %vm888_vm13, %v2874_v6, %v887_v38  ;;  %v891_v43 = vsel %vm888_vm13, %v887_v38, %v880_v54  ;;  %v1529_v10 = vld [vmem:[#allocation2 + $0x168] sm:$0xff]  ;;  %v1531_v37 = vld [vmem:[#allocation2 + $0x178] sm:$0xff] }
 0x159   : > { %1877 = vmatprep.subr.bf16.mxu0 %v1876_v0  ;;  %v922_v41 = vmul.f32 %v911_v3, %v890_v50  ;;  %v923_v25 = vmul.f32 %v915_v30, %v891_v43  ;;  %v1512_v45 = vld [vmem:[#allocation2 + $0xe0] sm:$0xff]  ;;  %v1522_v0 = vld [vmem:[#allocation2 + $0x130] sm:$0xff]  ;;  %v1533_v38 = vld [vmem:[#allocation2 + $0x188] sm:$0xff] }
 0x15a   : > { %983 = vst [vmem:[#allocation2 + $0xf0] sm:$0xf] %v979_v34  ;;  %984 = vst [vmem:[#allocation2 + $0xf8] sm:$0xf] %v980_v40  ;;  %v1049_v47 = vpop.permute.xlu1 %1048  ;;  %v1878_v55 = vpack.c.bf16 %v1512_v45, %v1508_v31  ;;  %v1528_v30 = vld [vmem:[#allocation2 + $0x160] sm:$0xff]  ;;  %v1888_v50 = vpack.c.bf16 %v1537_v32, %v1533_v38 }
 0x15b   : > { %926 = vst [vmem:[#allocation2 + $0xd0] sm:$0xf] %v922_v41  ;;  %927 = vst [vmem:[#allocation2 + $0xd8] sm:$0xf] %v923_v25  ;;  %v1096_v63 = vpop.permute.xlu0 %1095  ;;  %v1886_v33 = vpack.c.bf16 %v1528_v30, %v1524_v58  ;;  %v1536_v25 = vld [vmem:[#allocation2 + $0x1a0] sm:$0xf] }
 0x15c   : > { %v1104_v6 = vsel %vm1103_vm15, %v1096_v63, %v1098_v9  ;;  %1879 = vmatpush1.bf16.msra.mxu0 %v1878_v55  ;;  %v1532_v45 = vld [vmem:[#allocation2 + $0x180] sm:$0xff]  ;;  %v1539_v55 = vld [vmem:[#allocation2 + $0x1b8] sm:$0xf] }
 0x15d   : > { %v1136_v1 = vmul.f32 %v1119_v44, %v1104_v6  ;;  %v1527_v44 = vld [vmem:[#allocation2 + $0x158] sm:$0xff] }
 0x15e   : > { %v1047_v48 = vpop.permute.xlu1 %1046  ;;  %v1914_v31 = vpack.c.bf16 %v1531_v37, %v1527_v44 }
 0x15f   : > { %v1144_v53 = vrot.slane %v1136_v1, 4  ;;  %v1055_v21 = vsel %vm1054_vm0, %v1047_v48, %v1049_v47  ;;  %v1051_v54 = vpop.permute.xlu0 %1050  ;;  %v1483_v1 = vld [vmem:[#allocation6] sm:$0xff] }
 0x160   : > { %v1087_v19 = vmul.f32 %v1070_v52, %v1055_v21  ;;  %v1056_v57 = vsel %vm1054_vm0, %v1049_v47, %v1051_v54  ;;  %v1891_v47 = vpack.c.bf16 %v1536_v25, %v1532_v45  ;;  %v1535_v52 = vld [vmem:[#allocation2 + $0x198] sm:$0xff] }
 0x161   : > { %1152 = vst [vmem:[#allocation2 + $0x100] sm:$0xf0] %v1144_v53  ;;  %v1088_v61 = vmul.f32 %v1074_v42, %v1056_v57  ;;  %v1515_v56 = vld [vmem:[#allocation2 + $0xf8] sm:$0xff]  ;;  %v1514_v59 = vld [vmem:[#allocation2 + $0xf0] sm:$0xff]  ;;  %v1918_v42 = vpack.c.bf16 %v1539_v55, %v1535_v52 }
 0x162   : > { %1091 = vst [vmem:[#allocation2 + $0x100] sm:$0xf] %v1087_v19  ;;  %v1053_v60 = vpop.permute.xlu1 %1052  ;;  %v1511_v28 = vld [vmem:[#allocation2 + $0xd8] sm:$0xff]  ;;  %v1510_v4 = vld [vmem:[#allocation2 + $0xd0] sm:$0xff] }
 0x163   : > { %1092 = vst [vmem:[#allocation2 + $0x108] sm:$0xf] %v1088_v61  ;;  %v1057_v2 = vsel %vm1054_vm0, %v1051_v54, %v1053_v60  ;;  %v1063_v11 = vsel %vm1054_vm0, %v1053_v60, %v1047_v48  ;;  %v1102_v14 = vpop.permute.xlu0 %1101  ;;  %v1906_v24 = vpack.c.bf16 %v1515_v56, %v1511_v28  ;;  %v1908_v15 = vpack.c.bf16 %v1514_v59, %v1510_v4  ;;  %v1538_v48 = vld [vmem:[#allocation2 + $0x1b0] sm:$0xf] }
 0x164   : > { %v1089_v17 = vmul.f32 %v1078_v29, %v1057_v2  ;;  %v1090_v18 = vmul.f32 %v1082_v39, %v1063_v11  ;;  %v1106_v62 = vsel %vm1103_vm15, %v2898_v20, %v1102_v14  ;;  %v1112_v16 = vsel %vm1103_vm15, %v1102_v14, %v1096_v63  ;;  %v1525_v20 = vld [vmem:[#allocation2 + $0x148] sm:$0xff]  ;;  %v1526_v63 = vld [vmem:[#allocation2 + $0x150] sm:$0xff] }
 0x165   : > { %v1138_v5 = vmul.f32 %v1127_v7, %v1106_v62  ;;  %v1139_v51 = vmul.f32 %v1131_v8, %v1112_v16  ;;  %1907 = vmatprep.subr.bf16.mxu1 %v1906_v24  ;;  %v1884_v3 = vpack.c.bf16 %v1529_v10, %v1525_v20  ;;  %v1916_v6 = vpack.c.bf16 %v1530_v46, %v1526_v63  ;;  %v1534_v53 = vld [vmem:[#allocation2 + $0x190] sm:$0xff] }
 0x166   : > { %1093 = vst [vmem:[#allocation2 + $0x110] sm:$0xf] %v1089_v17  ;;  %1094 = vst [vmem:[#allocation2 + $0x118] sm:$0xf] %v1090_v18  ;;  %1909 = vmatpush1.bf16.msra.mxu1 %v1908_v15  ;;  %v1921_v21 = vpack.c.bf16 %v1538_v48, %v1534_v53 }
 0x167   : > { %v1146_v12 = vrot.slane %v1138_v5, 4  ;;  %v1147_v13 = vrot.slane %v1139_v51, 4 }
 0x169   : > { %1154 = vst [vmem:[#allocation2 + $0x110] sm:$0xf0] %v1146_v12  ;;  %1155 = vst [vmem:[#allocation2 + $0x118] sm:$0xf0] %v1147_v13  ;;  %v1516_v23 = vld [vmem:[#allocation2 + $0x100] sm:$0xff] }
 0x16a   : > { %v1517_v9 = vld [vmem:[#allocation2 + $0x108] sm:$0xff]  ;;  %v1882_v27 = vpack.c.bf16 %v1520_v26, %v1516_v23 }
 0x16b   : > { %v1880_v49 = vpack.c.bf16 %v1521_v36, %v1517_v9 }
 0x16d   : > { %1881 = vmatprep.subr.bf16.mxu0 %v1880_v49 }
 0x16e   : > { %1883 = vmatpush1.bf16.msra.mxu0 %v1882_v27 }
 0x16f   : > { %1885 = vmatprep.subr.bf16.mxu0 %v1884_v3 }
 0x170   : > { %v1519_v34 = vld [vmem:[#allocation2 + $0x118] sm:$0xff]  ;;  %v1518_v40 = vld [vmem:[#allocation2 + $0x110] sm:$0xff] }
 0x171   : > { %v1910_v43 = vpack.c.bf16 %v1523_v22, %v1519_v34  ;;  %v1912_v41 = vpack.c.bf16 %v1522_v0, %v1518_v40 }
 0x172   : > { %1887 = vmatpush1.bf16.msra.mxu0 %v1886_v33 }
 0x173   : > { %1890 = vmatprep.subr.msk.bf16.mxu0 %vm2933_vm3, %v1888_v50  ;;  %1911 = vmatprep.subr.bf16.mxu1 %v1910_v43 }
 0x174   : > { %1913 = vmatpush1.bf16.msra.mxu1 %v1912_v41 }
 0x175   : > { %1915 = vmatprep.subr.bf16.mxu1 %v1914_v31 }
 0x176   : > { %1893 = vmatpush1.bf16.msk.msra.mxu0 %vm2933_vm3, %v1891_v47 }
 0x178   : > { %1917 = vmatpush1.bf16.msra.mxu1 %v1916_v6 }
 0x179   : > { %1920 = vmatprep.subr.msk.bf16.mxu1 %vm2933_vm3, %v1918_v42  ;;  %1853 = vmatmul.mubr.msk.f32.vlgmr.msra.gmra.mrb[0].mxu0 %vm1540_vm4, %v1483_v1 }
 0x17c   : > { %1923 = vmatpush1.bf16.msk.msra.mxu1 %vm2933_vm3, %v1921_v21 }
 0x17f   : > { %1856 = vmatmul.mubr.msk.f32.vlgmr.msra.gmra.mrb[0].mxu1 %vm1540_vm4, %v1483_v1 }
 0x24c   : > { %v1623_v54 = vpop.f32.mrb[0].mxu0 }
 0x24d   : > { %v1625_v19 = vpop.f32.mrb[1].mxu0 }
 0x24e   : > { %v1699_v57 = vadd.f32 %v1625_v19, %v1623_v54 }
 0x252   : > { %v1694_v29 = vpop.f32.mrb[0].mxu1 }
 0x253   : > { %v1700_v39 = vadd.f32 %v1699_v57, %v1694_v29  ;;  %v1696_v61 = vpop.f32.mrb[1].mxu1 }
 0x255   : > { %v1701_v7 = vadd.f32 %v1700_v39, %v1696_v61 }
 0x257   : > { %1702 = vadd.xlane.f32.xlu0 %v1701_v7 }
 0x2e4   : > { %v1703_v8 = vpop.xlane.xlu0 %1702 }
 0x2e5   : > { %v1705_v56 = vmul.f32 0.001953125, %v1703_v8 }
 0x2e7   : > { %v1706_v59 = vsub.f32 %v1623_v54, %v1705_v56  ;;  %v1707_v60 = vsub.f32 %v1625_v19, %v1705_v56  ;;  %v1708_v28 = vsub.f32 %v1694_v29, %v1705_v56  ;;  %v1709_v4 = vsub.f32 %v1696_v61, %v1705_v56 }
 0x2e9   : > { %v1710_v2 = vmul.f32 %v1706_v59, %v1706_v59  ;;  %v1711_v11 = vmul.f32 %v1707_v60, %v1707_v60  ;;  %v1712_v14 = vmul.f32 %v1708_v28, %v1708_v28  ;;  %v1713_v15 = vmul.f32 %v1709_v4, %v1709_v4 }
 0x2eb   : > { %v1714_v24 = vadd.f32 %v1711_v11, %v1710_v2 }
 0x2ed   : > { %v1715_v17 = vadd.f32 %v1714_v24, %v1712_v14 }
 0x2ef   : > { %v1716_v18 = vadd.f32 %v1715_v17, %v1713_v15 }
 0x2f1   : > { %1717 = vadd.xlane.f32.xlu1 %v1716_v18 }
 0x37e   : > { %v1718_v62 = vpop.xlane.xlu1 %1717 }
 0x37f   : > { %v1719_v16 = vmul.f32 0.001953125, %v1718_v62 }
 0x381   : > { %v1720_v5 = vadd.f32 1e-05, %v1719_v16 }
 0x383   : > { %2016 = vrsqrt.f32 %v1720_v5 }
 0x38d   : > { %v2017_v51 = vpop.eup %2016 }
 0x38e   : > { %v1722_v12 = vmul.f32 %v2017_v51, %v1706_v59  ;;  %v1723_v13 = vmul.f32 %v2017_v51, %v1707_v60  ;;  %v1724_v23 = vmul.f32 %v2017_v51, %v1708_v28  ;;  %v1725_v26 = vmul.f32 %v2017_v51, %v1709_v4 }
 0x390   : > { %v1726_v9 = vmax.f32 %v1722_v12, 0.0  ;;  %v1727_v36 = vmax.f32 %v1723_v13, 0.0  ;;  %v1728_v27 = vmax.f32 %v1724_v23, 0.0  ;;  %v1729_v10 = vmax.f32 %v1725_v26, 0.0 }
 0x392   : > { %1730 = vst [vmem:[%s213_s18] sm:$0xff] %v1726_v9  ;;  %1731 = vst [vmem:[%s213_s18 + $0x8] sm:$0xff] %v1727_v36 }
 0x393   : > { %1732 = vst [vmem:[%s213_s18 + $0x10] sm:$0xff] %v1728_v27  ;;  %1733 = vst [vmem:[%s213_s18 + $0x18] sm:$0xff] %v1729_v10 }
 0x394   : > { %2117 = shalt.err (!%p2114_p7)
}
 0x395   : > { %s2118_s11 = scalar_lea.hbm %s2950_s29, 512  ;;  %s2122_s10 = scalar_lea.hbm %s2997_s3, 1024 }
 0x396   : > { %p2119_p10 = scmp.ne.s32.totalorder %s2950_s29, %s2118_s11  ;;  %p2123_p0 = scmp.lt.u32.totalorder %s2950_s29, %s2997_s3 }
 0x397   : > { %p2124_p9 = scmp.lt.u32.totalorder %s2122_s10, %s2118_s11  ;;  %p2126_p2 = scmp.lt.u32.totalorder %s2118_s11, %s2950_s29 }
 0x398   : > { %p2120_p13 = pnand %p2119_p10, %p2334_p4 }
 0x399   : > { %p2125_p11 = por %p2124_p9, %p2123_p0 }
 0x39a   : > { %p2121_p5 = pneg %p2120_p13 }
 0x39b   : > { %p2127_p1 = por %p2126_p2, %p2125_p11 }
 0x39d   : > { %p2128_p6 = pnand %p2127_p1, %p2121_p5 }
 0x39f   : > { %2131 = shalt.err (!%p2128_p6)
}
 0x3a0   : > { %1934 = dma.vmem_to_hbm [thread:$0]  (%p2334_p4), %s2952_s23, 512, %s2950_s29, %s1735_s16  }
 0x3a1 PF: > { %s1761_s28 = sand.u32 1, %s2162_s12   ;;  %p3014_p8 = scmp.ne.s32.totalorder %s3002_s19, 0 }
 0x3a2   : > { %p3015_p12 = scmp.ge.s32.totalorder %s2174_s15, 2  ;;  %s1762_s20 = scalar_lea.sflag [#allocation5], %s1761_s28 }
 0x3a4   : > { %p1948_p3 = pnand %p3015_p12, %p3014_p8 }
 0x3a6   : > { %2157 = dma.done.wait (!%p1948_p3), %s1762_s20, 512  }
 0x3a7   : > { %2159 = vsyncadd (!%p1948_p3), %s1762_s20, 4294966784  ;;  %p17_p7 = scmp.ge.s32.totalorder %s2324_s4, 4   ;;  %s3016_s12 = smov %s2166_s13 }
 0x3a8   : > { %s3017_s13 = smov %s2170_s14  ;;  %s3018_s14 = smov %s2340_s8 }
 0x3a9   : > { %s3019_s15 = smov %s2324_s4  ;;  %19 = sbr.rel (!%p17_p7) target bundleno = 6 (0x6), region = 110 }
 0x3b0   :  { %1767 = vsyncpa [#allocation4], 1 }
 0x3b1   :  { %1769 = vsyncpa [#allocation4 + $0x1], 1 }
 0x3b2   :  { %1770 = vsyncpa [#allocation7], 1 }
 0x3b3   :  { %1771 = vsyncpa [#allocation5], 1 }
 0x3b4   :  { %1773 = vsyncpa [#allocation5 + $0x1], 1 }

</bundles_post_ra>
